<compile_context>
chip_gen: v6e
topology: v6e:2x2x1
jax: 0.10.0
libtpu: 0.0.40
codegen_flags: <defaults>
</compile_context>

<pallas_src>
import jax
import jax.numpy as jnp
from jax import lax
from jax.experimental import pallas as pl
from jax.experimental.pallas import tpu as pltpu


# ----------------------------------------------------------------------------
# Fused kernel: one grid step == BB batch elements.
# ----------------------------------------------------------------------------
def _rva_fused_kernel(scal_ref, img_ref, qcap_ref, hq_ref,
                      w_img_ref, b_img_ref, w_q4_ref, b_q4_ref,
                      w_hq_ref, b_hq_ref, att_w_ref, infd_w_ref,
                      vh_ref, vq_ref, out_ref, stack_ref):
    f32 = jnp.float32
    att_bias = scal_ref[0]      # ATT_MODULE att.bias
    watt_dt = scal_ref[1]       # PAIR_MODULE att.weight (delta_t column)
    pair_c = scal_ref[2]        # folded PAIR constant
    inf_bd = scal_ref[3]        # INFER att.bias[0] - att.bias[1]

    BB, P, V = img_ref.shape
    RP = qcap_ref.shape[1]
    Wd = qcap_ref.shape[2]
    R = hq_ref.shape[1]
    H = att_w_ref.shape[1]

    # ---- GatedTrans embeddings on flattened, 8-sublane-aligned operands -----
    # image proposals: (BB*P, V) @ [Wy | Wg]
    vy = jnp.dot(img_ref[...].reshape(BB * P, V), w_img_ref[...],
                 preferred_element_type=f32) + b_img_ref[...]
    v_emb = (jnp.tanh(vy[:, :H]) * jax.nn.sigmoid(vy[:, H:])).reshape(BB, P, H)

    # question rounds + caption row (+ zero pad): (BB*RP, W) @ [inf_y|att_y|inf_g|att_g]
    qy = jnp.dot(qcap_ref[...].reshape(BB * RP, Wd), w_q4_ref[...],
                 preferred_element_type=f32) + b_q4_ref[...]
    g4 = jnp.tanh(qy[:, :2 * H]) * jax.nn.sigmoid(qy[:, 2 * H:])
    inf_emb = g4[:, :H].reshape(BB, RP, H)[:, :R]          # (BB,R,H)   INFER
    qc_emb = g4[:, H:].reshape(BB, RP, H)                  # (BB,RP,H)  ATT q+cap

    # ques_encoded | hist: (BB*R, 4H) @ block-diag [pair_q | pair_h]
    hy = jnp.dot(hq_ref[...].reshape(BB * R, 4 * H), w_hq_ref[...],
                 preferred_element_type=f32) + b_hq_ref[...]
    qe_emb3 = (jnp.tanh(hy[:, :H]) *
               jax.nn.sigmoid(hy[:, H:2 * H])).reshape(BB, R, H)
    h_emb3 = (jnp.tanh(hy[:, 2 * H:3 * H]) *
              jax.nn.sigmoid(hy[:, 3 * H:])).reshape(BB, R, H)

    # ---- ATT_MODULE: softmax_p( normalize(v_p*q_r).w + bias ) ---------------
    #   = softmax_p( ((q*w).v) * rsqrt(max(||q*v||^2, 1e-24)) + bias )
    aw = att_w_ref[...].reshape(1, 1, H)
    dotw = jnp.einsum('brh,bph->brp', qc_emb * aw, v_emb,
                      preferred_element_type=f32)          # (BB,RP,P)
    sq = jnp.einsum('brh,bph->brp', qc_emb * qc_emb, v_emb * v_emb,
                    preferred_element_type=f32)            # (BB,RP,P)
    score = dotw * lax.rsqrt(jnp.maximum(sq, 1e-24)) + att_bias
    e = jnp.exp(score - jnp.max(score, axis=-1, keepdims=True))
    att_all = e / jnp.sum(e, axis=-1, keepdims=True)       # (BB,RP,P)
    att_q = att_all[:, :R]                                 # (BB,R,P) question att
    att_c = att_all[:, R:R + 1, :]                         # (BB,1,P) caption att

    # ---- INFER head (eval branch): one lane reduction on the logit diff ------
    # TODO(synk): training-mode F.gumbel_softmax (stochastic) not implemented;
    #             eval hard-argmax branch only (matches module.eval()).
    nrm = jnp.sqrt(jnp.sum(inf_emb * inf_emb, axis=-1, keepdims=True))
    n_emb = inf_emb / jnp.maximum(nrm, 1e-12)              # F.normalize
    d = jnp.sum(n_emb * infd_w_ref[...].reshape(1, 1, H), axis=-1,
                keepdims=True) + inf_bd                    # l0 - l1, (BB,R,1)
    gs0 = (d >= 0.0).astype(f32)          # first max on ties (torch argmax)
    gs1 = 1.0 - gs0
    lam0 = jax.nn.sigmoid(d)              # softmax([l0,l1]) = [sig(d), 1-sig(d)]
    a_coef = gs0 + gs1 * lam0                              # (BB,R,1)
    b_coef = gs1 * (1.0 - lam0)                            # (BB,R,1)

    # ---- PAIR head (MLP + Linear(2,1) folded into two H-vectors + scalars) ---
    s_q = jnp.sum(qe_emb3 * vq_ref[...].reshape(1, 1, H),
                  axis=-1, keepdims=True)                  # (BB,R,1)
    vh_b = jnp.broadcast_to(vh_ref[...].reshape(1, 1, H), (BB, 1, H))
    s_h = jnp.einsum('bxh,bjh->bxj', vh_b, h_emb3,
                     preferred_element_type=f32)           # (BB,1,R)
    row_i = lax.broadcasted_iota(jnp.int32, (R, R), 0)
    col_i = lax.broadcasted_iota(jnp.int32, (R, R), 1)
    valid = col_i <= row_i
    delta_t = jnp.where(valid, (row_i - col_i + 1).astype(f32), 0.0)
    plog = s_q + s_h + (watt_dt * delta_t + pair_c)[None]  # (BB,R,R)
    masked = jnp.where(valid[None], plog, -jnp.inf)
    mx = jnp.max(masked, axis=-1, keepdims=True)
    idx = jnp.min(jnp.where(masked == mx, col_i[None], jnp.int32(R + 1)),
                  axis=-1, keepdims=True)                  # first-max column
    hgs = (col_i[None] == idx).astype(f32)                 # one-hot in causal prefix

    # ---- static slabs of the single merged output block ----------------------
    out_ref[:, :, P:2 * P] = att_q
    out_ref[:, :, 2 * P:2 * P + R] = hgs
    out_ref[:, :, 2 * P + R:2 * P + R + 1] = gs0
    out_ref[:, :, 2 * P + R + 1:2 * P + R + 2] = gs1

    # ---- RvA refinement: O(R) one-hot matvec against a running VMEM stack ----
    # stack slot 0 = caption attention, slot j (j>=1) = refined round j-1.
    stack_ref[...] = jnp.zeros((BB, R, P), f32)
    stack_ref[:, 0:1, :] = att_c
    for i in range(R):
        sel = hgs[:, i:i + 1, :]                                    # (BB,1,R)
        temp = jnp.einsum('bxj,bjp->bxp', sel, stack_ref[...],
                          preferred_element_type=f32)               # (BB,1,P)
        row = (a_coef[:, i:i + 1, :] * att_q[:, i:i + 1, :]
               + b_coef[:, i:i + 1, :] * temp)                      # (BB,1,P)
        out_ref[:, i:i + 1, 0:P] = row
        if i + 1 < R:
            stack_ref[:, i + 1:i + 2, :] = row


# ----------------------------------------------------------------------------
# Parameters (deterministic synthetic init: kaiming_uniform weights, zero bias)
# Linear weights stored as (in_features, out_features).
# ----------------------------------------------------------------------------
def make_params(key, cfg):
    H = cfg["lstm_hidden_size"]
    V = cfg["img_feature_size"]
    W = cfg["word_embedding_size"]

    def kaiming(k, fan_in, shape):
        bound = (6.0 / fan_in) ** 0.5
        return jax.random.uniform(k, shape, jnp.float32, -bound, bound)

    ks = iter(jax.random.split(key, 16))
    z = lambda *s: jnp.zeros(s, jnp.float32)
    p = {
        # ATT_MODULE
        "att_v_wy": kaiming(next(ks), V, (V, H)), "att_v_by": z(H),
        "att_v_wg": kaiming(next(ks), V, (V, H)), "att_v_bg": z(H),
        "att_q_wy": kaiming(next(ks), W, (W, H)), "att_q_by": z(H),
        "att_q_wg": kaiming(next(ks), W, (W, H)), "att_q_bg": z(H),
        "att_w": kaiming(next(ks), H, (H,)), "att_b": z(1),
        # INFER_MODULE
        "inf_wy": kaiming(next(ks), W, (W, H)), "inf_by": z(H),
        "inf_wg": kaiming(next(ks), W, (W, H)), "inf_bg": z(H),
        "inf_att_w": kaiming(next(ks), H, (H, 2)), "inf_att_b": z(2),
        # PAIR_MODULE
        "pair_h_wy": kaiming(next(ks), 2 * H, (2 * H, H)), "pair_h_by": z(H),
        "pair_h_wg": kaiming(next(ks), 2 * H, (2 * H, H)), "pair_h_bg": z(H),
        "pair_q_wy": kaiming(next(ks), 2 * H, (2 * H, H)), "pair_q_by": z(H),
        "pair_q_wg": kaiming(next(ks), 2 * H, (2 * H, H)), "pair_q_bg": z(H),
        "pair_mlp_w1": kaiming(next(ks), 2 * H, (2 * H, H)), "pair_mlp_b1": z(H),
        "pair_mlp_w2": kaiming(next(ks), H, (H,)), "pair_mlp_b2": z(1),
        "pair_att_w": kaiming(next(ks), 2, (2,)), "pair_att_b": z(1),
    }
    return p


# ----------------------------------------------------------------------------
# RvA_MODULE.forward : host-side packing + single fused, batch-blocked call
# ----------------------------------------------------------------------------
def rva_forward(params, img, ques, hist, *, num_blocks=None):
    cap_feat, ques_feat, ques_encoded = ques
    B, R, Wd = ques_feat.shape
    P, V = img.shape[1], img.shape[2]
    H = params["att_w"].shape[0]
    H2 = 2 * H
    assert cap_feat.shape[1] == 1, "caption is a single round"
    assert ques_encoded.shape[-1] == H2 and hist.shape[-1] == H2

    if num_blocks is None:
        # Keep the grid even when possible so both v7x TensorCores get work;
        # on v5e/v6e the grid is a sequential loop so fewer/bigger blocks win.
        num_blocks = 2 if B % 2 == 0 else 1
    assert B % num_blocks == 0
    BB = B // num_blocks

    # ---- coalesced inputs ----------------------------------------------------
    RP = ((R + 1 + 7) // 8) * 8        # ques rounds + caption, padded to 8 rows
    pieces = [ques_feat, cap_feat]
    if RP > R + 1:
        pieces.append(jnp.zeros((B, RP - (R + 1), Wd), ques_feat.dtype))
    qcap = jnp.concatenate(pieces, axis=1)                     # (B, RP, Wd)
    hq = jnp.concatenate([ques_encoded, hist], axis=-1)        # (B, R, 4H)

    # ---- weight packing (GatedTrans pairs stacked / block-diagonal) ----------
    cat1 = lambda *xs: jnp.concatenate(xs, axis=1)
    w_img = cat1(params["att_v_wy"], params["att_v_wg"])                  # (V,2H)
    b_img = jnp.concatenate([params["att_v_by"], params["att_v_bg"]]).reshape(1, H2)
    w_q4 = cat1(params["inf_wy"], params["att_q_wy"],
                params["inf_wg"], params["att_q_wg"])                     # (W,4H)
    b_q4 = jnp.concatenate([params["inf_by"], params["att_q_by"],
                            params["inf_bg"], params["att_q_bg"]]).reshape(1, 4 * H)
    z22 = jnp.zeros((H2, H2), jnp.float32)
    w_hq = jnp.concatenate([
        jnp.concatenate([params["pair_q_wy"], params["pair_q_wg"], z22], axis=1),
        jnp.concatenate([z22, params["pair_h_wy"], params["pair_h_wg"]], axis=1),
    ], axis=0)                                                            # (4H,4H)
    b_hq = jnp.concatenate([params["pair_q_by"], params["pair_q_bg"],
                            params["pair_h_by"], params["pair_h_bg"]]).reshape(1, 4 * H)

    att_w = params["att_w"].reshape(1, H)
    infd_w = (params["inf_att_w"][:, 0] - params["inf_att_w"][:, 1]).reshape(1, H)
    inf_bd = params["inf_att_b"][0] - params["inf_att_b"][1]

    # PAIR MLP (Linear(2H,H) -> Linear(H,1), no nonlinearity, eval dropout=id)
    # plus the final Linear(2,1) folded offline into two H-vectors + scalars.
    w1, w2 = params["pair_mlp_w1"], params["pair_mlp_w2"]
    watt, batt = params["pair_att_w"], params["pair_att_b"][0]
    vh = (watt[0] * (w1[:H] @ w2)).reshape(1, H)          # hist side of the cat
    vq = (watt[0] * (w1[H:] @ w2)).reshape(1, H)          # ques side of the cat
    pair_c = watt[0] * (jnp.dot(params["pair_mlp_b1"], w2)
                        + params["pair_mlp_b2"][0]) + batt
    scal = jnp.stack([params["att_b"][0], watt[1], pair_c, inf_bd]).astype(jnp.float32)

    OUT = 2 * P + R + 2
    batch3 = lambda g: (g, 0, 0)
    const2 = lambda g: (0, 0)

    def nbytes(*shape):
        n = 4
        for s in shape:
            n *= s
        return n
    block_bytes = (nbytes(BB, P, V) + nbytes(BB, RP, Wd)
                   + nbytes(BB, R, 4 * H) + nbytes(BB, R, OUT))
    weight_bytes = (nbytes(V, H2) + nbytes(Wd, 4 * H) + nbytes(4 * H, 4 * H)
                    + nbytes(1, H2) + 2 * nbytes(1, 4 * H) + 4 * nbytes(1, H))
    vmem_limit = int(min(64 * 2 ** 20,
                         max(32 * 2 ** 20,
                             4 * block_bytes + 2 * weight_bytes + nbytes(BB, R, P))))

    out = pl.pallas_call(
        _rva_fused_kernel,
        grid=(num_blocks,),
        in_specs=[
            pl.BlockSpec(memory_space=pltpu.MemorySpace.SMEM),        # scalars (4,)
            pl.BlockSpec((BB, P, V), batch3),                         # img
            pl.BlockSpec((BB, RP, Wd), batch3),                       # ques + caption
            pl.BlockSpec((BB, R, 4 * H), batch3),                     # qenc | hist
            pl.BlockSpec((V, H2), const2), pl.BlockSpec((1, H2), const2),
            pl.BlockSpec((Wd, 4 * H), const2), pl.BlockSpec((1, 4 * H), const2),
            pl.BlockSpec((4 * H, 4 * H), const2), pl.BlockSpec((1, 4 * H), const2),
            pl.BlockSpec((1, H), const2), pl.BlockSpec((1, H), const2),
            pl.BlockSpec((1, H), const2), pl.BlockSpec((1, H), const2),
        ],
        out_specs=pl.BlockSpec((BB, R, OUT), batch3),
        out_shape=jax.ShapeDtypeStruct((B, R, OUT), jnp.float32),
        scratch_shapes=[pltpu.VMEM((BB, R, P), jnp.float32)],
        compiler_params=pltpu.CompilerParams(
            dimension_semantics=("parallel",),
            vmem_limit_bytes=vmem_limit),
    )(scal, img, qcap, hq, w_img, b_img, w_q4, b_q4, w_hq, b_hq,
      att_w, infd_w, vh, vq)

    img_att_refined = out[..., :P]
    img_att_ques = out[..., P:2 * P]
    hist_gs_set = out[..., 2 * P:2 * P + R]
    ques_gs = out[..., 2 * P + R:2 * P + R + 2]
    return img_att_refined, (ques_gs, hist_gs_set, img_att_ques)


# ----------------------------------------------------------------------------
# Pure-JAX reference of the PyTorch eval forward (for correctness checking).
# ----------------------------------------------------------------------------
def _gated_ref(x, wy, by, wg, bg):
    return jnp.tanh(x @ wy + by) * jax.nn.sigmoid(x @ wg + bg)


def _att_ref(p, img, ques):
    B, R, W = ques.shape
    P = img.shape[1]
    H = p["att_w"].shape[0]
    v = _gated_ref(img.reshape(-1, img.shape[-1]), p["att_v_wy"], p["att_v_by"],
                   p["att_v_wg"], p["att_v_bg"]).reshape(B, P, H)
    q = _gated_ref(ques.reshape(-1, W), p["att_q_wy"], p["att_q_by"],
                   p["att_q_wg"], p["att_q_bg"]).reshape(B, R, H)
    prod = q[:, :, None, :] * v[:, None, :, :]                       # (B,R,P,H)
    nrm = jnp.sqrt(jnp.sum(prod * prod, axis=-1, keepdims=True))
    att_embed = prod / jnp.maximum(nrm, 1e-12)
    score = jnp.einsum('brph,h->brp', att_embed, p["att_w"]) + p["att_b"][0]
    return jax.nn.softmax(score, axis=-1)


def _infer_ref(p, ques):
    B, R, W = ques.shape
    e = _gated_ref(ques.reshape(-1, W), p["inf_wy"], p["inf_by"],
                   p["inf_wg"], p["inf_bg"])
    nrm = jnp.sqrt(jnp.sum(e * e, axis=-1, keepdims=True))
    e = e / jnp.maximum(nrm, 1e-12)
    logits = e @ p["inf_att_w"] + p["inf_att_b"]
    gs = jax.nn.one_hot(jnp.argmax(logits, axis=-1), 2, dtype=jnp.float32)
    lam = jax.nn.softmax(logits, axis=-1)
    return gs.reshape(B, R, 2), lam.reshape(B, R, 2)


def _pair_ref(p, hist, ques_enc):
    B, R, H2 = hist.shape
    H = H2 // 2
    h = _gated_ref(hist.reshape(-1, H2), p["pair_h_wy"], p["pair_h_by"],
                   p["pair_h_wg"], p["pair_h_bg"]).reshape(B, R, H)
    q = _gated_ref(ques_enc.reshape(-1, H2), p["pair_q_wy"], p["pair_q_by"],
                   p["pair_q_wg"], p["pair_q_bg"]).reshape(B, R, H)
    h_rep = jnp.broadcast_to(h[:, None, :, :], (B, R, R, H))
    q_rep = jnp.broadcast_to(q[:, :, None, :], (B, R, R, H))
    att_embed = jnp.concatenate([h_rep, q_rep], axis=-1)             # (B,R,R,2H)
    score = ((att_embed @ p["pair_mlp_w1"] + p["pair_mlp_b1"])
             @ p["pair_mlp_w2"] + p["pair_mlp_b2"][0])               # (B,R,R)
    i_idx = jnp.arange(R)[:, None]
    j_idx = jnp.arange(R)[None, :]
    delta_t = jnp.where(j_idx <= i_idx, i_idx - j_idx + 1, 0).astype(jnp.float32)
    w, b = p["pair_att_w"], p["pair_att_b"][0]
    logits = w[0] * score + w[1] * delta_t[None] + b                 # (B,R,R)
    gs_set = jnp.zeros((B, R, R), jnp.float32)
    for i in range(R):
        li = logits[:, i, :i + 1]
        oh = jax.nn.one_hot(jnp.argmax(li, axis=-1), i + 1, dtype=jnp.float32)
        gs_set = gs_set.at[:, i, :i + 1].set(oh)
    return gs_set


def _rva_reference(params, img, ques, hist):
    cap_feat, ques_feat, ques_encoded = ques
    B, R, _ = ques_feat.shape
    gs, lam = _infer_ref(params, ques_feat)
    hist_gs_set = _pair_ref(params, hist, ques_encoded)
    att_q = _att_ref(params, img, ques_feat)                         # (B,R,P)
    att_c = _att_ref(params, img, cap_feat)                          # (B,1,P)
    rows = []
    for i in range(R):
        if i == 0:
            temp = att_c[:, 0, :]
        else:
            hgs = hist_gs_set[:, i, :i + 1]
            stack = jnp.concatenate([att_c, jnp.stack(rows, axis=1)], axis=1)
            temp = jnp.sum(hgs[..., None] * stack, axis=1)
        a = gs[:, i, 0] + gs[:, i, 1] * lam[:, i, 0]
        b = gs[:, i, 1] * lam[:, i, 1]
        rows.append(a[:, None] * att_q[:, i, :] + b[:, None] * temp)
    refined = jnp.stack(rows, axis=1)
    return refined, (gs, hist_gs_set, att_q)


if __name__ == "__main__":
    cfg = dict(img_feature_size=48, word_embedding_size=32,
               lstm_hidden_size=32, dropout_fc=0.0)
    B, R, P = 2, 8, 16
    H = cfg["lstm_hidden_size"]

    key = jax.random.PRNGKey(0)
    kimg, kq, kc, kqe, kh, kp = jax.random.split(key, 6)
    img = jax.random.normal(kimg, (B, P, cfg["img_feature_size"]), jnp.float32)
    ques_feat = jax.random.normal(kq, (B, R, cfg["word_embedding_size"]), jnp.float32)
    cap_feat = jax.random.normal(kc, (B, 1, cfg["word_embedding_size"]), jnp.float32)
    ques_encoded = jax.random.normal(kqe, (B, R, 2 * H), jnp.float32)
    hist = jax.random.normal(kh, (B, R, 2 * H), jnp.float32)
    params = make_params(kp, cfg)
    ques = (cap_feat, ques_feat, ques_encoded)

    fwd = jax.jit(rva_forward)
    img_att_refined, (ques_gs, hist_gs_set, img_att_ques) = fwd(params, img, ques, hist)
    jax.block_until_ready((img_att_refined, ques_gs, hist_gs_set, img_att_ques))

    # shape / distribution sanity
    assert img_att_refined.shape == (B, R, P)
    assert ques_gs.shape == (B, R, 2)
    assert hist_gs_set.shape == (B, R, R)
    assert img_att_ques.shape == (B, R, P)
    assert jnp.allclose(jnp.sum(img_att_ques, axis=-1), 1.0, atol=1e-5)
    assert jnp.allclose(jnp.sum(ques_gs, axis=-1), 1.0, atol=1e-6)
    assert jnp.allclose(jnp.sum(hist_gs_set, axis=-1), 1.0, atol=1e-6)

    # compare against a pure-JAX transcription of the PyTorch eval forward
    r_ref, (gs_ref, hgs_ref, attq_ref) = jax.jit(_rva_reference)(params, img, ques, hist)
    jax.block_until_ready(r_ref)
    assert jnp.array_equal(ques_gs, gs_ref)
    assert jnp.array_equal(hist_gs_set, hgs_ref)
    assert jnp.allclose(img_att_ques, attq_ref, atol=5e-4, rtol=5e-4)
    assert jnp.allclose(img_att_refined, r_ref, atol=5e-4, rtol=5e-4)
    print("KERNEL_OK")
</pallas_src>

<mosaic_0001>
module attributes {stable_mosaic.version = 11 : i64} {
  func.func @_rva_fused_kernel(%arg0: i32, %arg1: memref<4xf32, #tpu.memory_space<smem>>, %arg2: memref<1x16x48xf32, #tpu.memory_space<vmem>>, %arg3: memref<1x16x32xf32, #tpu.memory_space<vmem>>, %arg4: memref<1x8x128xf32, #tpu.memory_space<vmem>>, %arg5: memref<48x64xf32, #tpu.memory_space<vmem>>, %arg6: memref<1x64xf32, #tpu.memory_space<vmem>>, %arg7: memref<32x128xf32, #tpu.memory_space<vmem>>, %arg8: memref<1x128xf32, #tpu.memory_space<vmem>>, %arg9: memref<128x128xf32, #tpu.memory_space<vmem>>, %arg10: memref<1x128xf32, #tpu.memory_space<vmem>>, %arg11: memref<1x32xf32, #tpu.memory_space<vmem>>, %arg12: memref<1x32xf32, #tpu.memory_space<vmem>>, %arg13: memref<1x32xf32, #tpu.memory_space<vmem>>, %arg14: memref<1x32xf32, #tpu.memory_space<vmem>>, %arg15: memref<1x8x42xf32, #tpu.memory_space<vmem>>, %arg16: memref<1x8x16xf32, #tpu.memory_space<vmem>>) attributes {dimension_semantics = [#tpu.dimension_semantics<parallel>], iteration_bounds = array<i64: 2>, scalar_prefetch = 0 : i64, scratch_operands = 1 : i64, tpu.core_type = #tpu.core_type<tc>, window_params = [{transform_indices = @transform_0, window_bounds = array<i64: 4>}, {transform_indices = @transform_1, window_bounds = array<i64: 1, 16, 48>}, {transform_indices = @transform_2, window_bounds = array<i64: 1, 16, 32>}, {transform_indices = @transform_3, window_bounds = array<i64: 1, 8, 128>}, {pipeline_mode = #tpu.pipeline_mode<synchronous>, transform_indices = @transform_4, window_bounds = array<i64: 48, 64>}, {pipeline_mode = #tpu.pipeline_mode<synchronous>, transform_indices = @transform_5, window_bounds = array<i64: 1, 64>}, {pipeline_mode = #tpu.pipeline_mode<synchronous>, transform_indices = @transform_6, window_bounds = array<i64: 32, 128>}, {pipeline_mode = #tpu.pipeline_mode<synchronous>, transform_indices = @transform_7, window_bounds = array<i64: 1, 128>}, {pipeline_mode = #tpu.pipeline_mode<synchronous>, transform_indices = @transform_8, window_bounds = array<i64: 128, 128>}, {pipeline_mode = #tpu.pipeline_mode<synchronous>, transform_indices = @transform_9, window_bounds = array<i64: 1, 128>}, {pipeline_mode = #tpu.pipeline_mode<synchronous>, transform_indices = @transform_10, window_bounds = array<i64: 1, 32>}, {pipeline_mode = #tpu.pipeline_mode<synchronous>, transform_indices = @transform_11, window_bounds = array<i64: 1, 32>}, {pipeline_mode = #tpu.pipeline_mode<synchronous>, transform_indices = @transform_12, window_bounds = array<i64: 1, 32>}, {pipeline_mode = #tpu.pipeline_mode<synchronous>, transform_indices = @transform_13, window_bounds = array<i64: 1, 32>}, {transform_indices = @transform_14, window_bounds = array<i64: 1, 8, 42>}]} {
    %c0 = arith.constant 0 : index
    %0 = memref.load %arg1[%c0] : memref<4xf32, #tpu.memory_space<smem>>
    %c1 = arith.constant 1 : index
    %1 = memref.load %arg1[%c1] : memref<4xf32, #tpu.memory_space<smem>>
    %c2 = arith.constant 2 : index
    %2 = memref.load %arg1[%c2] : memref<4xf32, #tpu.memory_space<smem>>
    %c3 = arith.constant 3 : index
    %3 = memref.load %arg1[%c3] : memref<4xf32, #tpu.memory_space<smem>>
    %c0_0 = arith.constant 0 : index
    %c0_1 = arith.constant 0 : index
    %c0_2 = arith.constant 0 : index
    %4 = vector.load %arg2[%c0_0, %c0_1, %c0_2] : memref<1x16x48xf32, #tpu.memory_space<vmem>>, vector<1x16x48xf32>
    %5 = vector.shape_cast %4 : vector<1x16x48xf32> to vector<16x48xf32>
    %c0_3 = arith.constant 0 : index
    %c0_4 = arith.constant 0 : index
    %6 = vector.load %arg5[%c0_3, %c0_4] : memref<48x64xf32, #tpu.memory_space<vmem>>, vector<48x64xf32>
    %cst = arith.constant dense<0.000000e+00> : vector<16x64xf32>
    %7 = tpu.matmul %5, %6, %cst {dimension_numbers = #tpu.dot_dimension_numbers<[1], [0], [0], [1], [0, 0, 1, 1], [], []>} : vector<16x48xf32>, vector<48x64xf32>, vector<16x64xf32> -> vector<16x64xf32>
    %c0_5 = arith.constant 0 : index
    %c0_6 = arith.constant 0 : index
    %8 = vector.load %arg6[%c0_5, %c0_6] : memref<1x64xf32, #tpu.memory_space<vmem>>, vector<1x64xf32>
    %9 = vector.broadcast %8 : vector<1x64xf32> to vector<16x64xf32>
    %10 = arith.addf %7, %9 : vector<16x64xf32>
    %11 = vector.extract_strided_slice %10 {offsets = [0, 0], sizes = [16, 32], strides = [1, 1]} : vector<16x64xf32> to vector<16x32xf32>
    %12 = math.tanh %11 : vector<16x32xf32>
    %13 = vector.extract_strided_slice %10 {offsets = [0, 32], sizes = [16, 32], strides = [1, 1]} : vector<16x64xf32> to vector<16x32xf32>
    %14 = arith.negf %13 : vector<16x32xf32>
    %15 = math.exp %14 : vector<16x32xf32>
    %cst_7 = arith.constant 1.000000e+00 : f32
    %16 = vector.broadcast %cst_7 : f32 to vector<16x32xf32>
    %17 = arith.addf %16, %15 : vector<16x32xf32>
    %18 = arith.divf %16, %17 : vector<16x32xf32>
    %19 = arith.mulf %12, %18 : vector<16x32xf32>
    %20 = vector.shape_cast %19 : vector<16x32xf32> to vector<1x16x32xf32>
    %c0_8 = arith.constant 0 : index
    %c0_9 = arith.constant 0 : index
    %c0_10 = arith.constant 0 : index
    %21 = vector.load %arg3[%c0_8, %c0_9, %c0_10] : memref<1x16x32xf32, #tpu.memory_space<vmem>>, vector<1x16x32xf32>
    %22 = vector.shape_cast %21 : vector<1x16x32xf32> to vector<16x32xf32>
    %c0_11 = arith.constant 0 : index
    %c0_12 = arith.constant 0 : index
    %23 = vector.load %arg7[%c0_11, %c0_12] : memref<32x128xf32, #tpu.memory_space<vmem>>, vector<32x128xf32>
    %cst_13 = arith.constant dense<0.000000e+00> : vector<16x128xf32>
    %24 = tpu.matmul %22, %23, %cst_13 {dimension_numbers = #tpu.dot_dimension_numbers<[1], [0], [0], [1], [0, 0, 1, 1], [], []>} : vector<16x32xf32>, vector<32x128xf32>, vector<16x128xf32> -> vector<16x128xf32>
    %c0_14 = arith.constant 0 : index
    %c0_15 = arith.constant 0 : index
    %25 = vector.load %arg8[%c0_14, %c0_15] : memref<1x128xf32, #tpu.memory_space<vmem>>, vector<1x128xf32>
    %26 = vector.broadcast %25 : vector<1x128xf32> to vector<16x128xf32>
    %27 = arith.addf %24, %26 : vector<16x128xf32>
    %28 = vector.extract_strided_slice %27 {offsets = [0, 0], sizes = [16, 64], strides = [1, 1]} : vector<16x128xf32> to vector<16x64xf32>
    %29 = math.tanh %28 : vector<16x64xf32>
    %30 = vector.extract_strided_slice %27 {offsets = [0, 64], sizes = [16, 64], strides = [1, 1]} : vector<16x128xf32> to vector<16x64xf32>
    %31 = arith.negf %30 : vector<16x64xf32>
    %32 = math.exp %31 : vector<16x64xf32>
    %cst_16 = arith.constant 1.000000e+00 : f32
    %33 = vector.broadcast %cst_16 : f32 to vector<16x64xf32>
    %34 = arith.addf %33, %32 : vector<16x64xf32>
    %35 = arith.divf %33, %34 : vector<16x64xf32>
    %36 = arith.mulf %29, %35 : vector<16x64xf32>
    %37 = vector.extract_strided_slice %36 {offsets = [0, 0], sizes = [16, 32], strides = [1, 1]} : vector<16x64xf32> to vector<16x32xf32>
    %38 = vector.shape_cast %37 : vector<16x32xf32> to vector<1x16x32xf32>
    %39 = vector.extract_strided_slice %38 {offsets = [0, 0, 0], sizes = [1, 8, 32], strides = [1, 1, 1]} : vector<1x16x32xf32> to vector<1x8x32xf32>
    %40 = vector.extract_strided_slice %36 {offsets = [0, 32], sizes = [16, 32], strides = [1, 1]} : vector<16x64xf32> to vector<16x32xf32>
    %41 = vector.shape_cast %40 : vector<16x32xf32> to vector<1x16x32xf32>
    %c0_17 = arith.constant 0 : index
    %c0_18 = arith.constant 0 : index
    %c0_19 = arith.constant 0 : index
    %42 = vector.load %arg4[%c0_17, %c0_18, %c0_19] : memref<1x8x128xf32, #tpu.memory_space<vmem>>, vector<1x8x128xf32>
    %43 = vector.shape_cast %42 : vector<1x8x128xf32> to vector<8x128xf32>
    %c0_20 = arith.constant 0 : index
    %c0_21 = arith.constant 0 : index
    %44 = vector.load %arg9[%c0_20, %c0_21] : memref<128x128xf32, #tpu.memory_space<vmem>>, vector<128x128xf32>
    %cst_22 = arith.constant dense<0.000000e+00> : vector<8x128xf32>
    %45 = tpu.matmul %43, %44, %cst_22 {dimension_numbers = #tpu.dot_dimension_numbers<[1], [0], [0], [1], [0, 0, 1, 1], [], []>} : vector<8x128xf32>, vector<128x128xf32>, vector<8x128xf32> -> vector<8x128xf32>
    %c0_23 = arith.constant 0 : index
    %c0_24 = arith.constant 0 : index
    %46 = vector.load %arg10[%c0_23, %c0_24] : memref<1x128xf32, #tpu.memory_space<vmem>>, vector<1x128xf32>
    %47 = vector.broadcast %46 : vector<1x128xf32> to vector<8x128xf32>
    %48 = arith.addf %45, %47 : vector<8x128xf32>
    %49 = vector.extract_strided_slice %48 {offsets = [0, 0], sizes = [8, 32], strides = [1, 1]} : vector<8x128xf32> to vector<8x32xf32>
    %50 = math.tanh %49 : vector<8x32xf32>
    %51 = vector.extract_strided_slice %48 {offsets = [0, 32], sizes = [8, 32], strides = [1, 1]} : vector<8x128xf32> to vector<8x32xf32>
    %52 = arith.negf %51 : vector<8x32xf32>
    %53 = math.exp %52 : vector<8x32xf32>
    %cst_25 = arith.constant 1.000000e+00 : f32
    %54 = vector.broadcast %cst_25 : f32 to vector<8x32xf32>
    %55 = arith.addf %54, %53 : vector<8x32xf32>
    %56 = arith.divf %54, %55 : vector<8x32xf32>
    %57 = arith.mulf %50, %56 : vector<8x32xf32>
    %58 = vector.shape_cast %57 : vector<8x32xf32> to vector<1x8x32xf32>
    %59 = vector.extract_strided_slice %48 {offsets = [0, 64], sizes = [8, 32], strides = [1, 1]} : vector<8x128xf32> to vector<8x32xf32>
    %60 = math.tanh %59 : vector<8x32xf32>
    %61 = vector.extract_strided_slice %48 {offsets = [0, 96], sizes = [8, 32], strides = [1, 1]} : vector<8x128xf32> to vector<8x32xf32>
    %62 = arith.negf %61 : vector<8x32xf32>
    %63 = math.exp %62 : vector<8x32xf32>
    %cst_26 = arith.constant 1.000000e+00 : f32
    %64 = vector.broadcast %cst_26 : f32 to vector<8x32xf32>
    %65 = arith.addf %64, %63 : vector<8x32xf32>
    %66 = arith.divf %64, %65 : vector<8x32xf32>
    %67 = arith.mulf %60, %66 : vector<8x32xf32>
    %68 = vector.shape_cast %67 : vector<8x32xf32> to vector<1x8x32xf32>
    %c0_27 = arith.constant 0 : index
    %c0_28 = arith.constant 0 : index
    %69 = vector.load %arg11[%c0_27, %c0_28] : memref<1x32xf32, #tpu.memory_space<vmem>>, vector<1x32xf32>
    %70 = vector.shape_cast %69 : vector<1x32xf32> to vector<1x1x32xf32>
    %71 = vector.broadcast %70 : vector<1x1x32xf32> to vector<1x16x32xf32>
    %72 = arith.mulf %41, %71 : vector<1x16x32xf32>
    "tpu.trace_start"() <{level = 10 : i32, message = "brh,bph->brp"}> : () -> ()
    %cst_29 = arith.constant dense<0.000000e+00> : vector<1x16x16xf32>
    %73 = tpu.matmul %72, %20, %cst_29 {dimension_numbers = #tpu.dot_dimension_numbers<[2], [2], [1], [1], [0, 0, 0, 1, 1, 1], [0], [0]>} : vector<1x16x32xf32>, vector<1x16x32xf32>, vector<1x16x16xf32> -> vector<1x16x16xf32>
    "tpu.trace_stop"() : () -> ()
    %74 = arith.mulf %41, %41 : vector<1x16x32xf32>
    %75 = arith.mulf %20, %20 : vector<1x16x32xf32>
    "tpu.trace_start"() <{level = 10 : i32, message = "brh,bph->brp"}> : () -> ()
    %cst_30 = arith.constant dense<0.000000e+00> : vector<1x16x16xf32>
    %76 = tpu.matmul %74, %75, %cst_30 {dimension_numbers = #tpu.dot_dimension_numbers<[2], [2], [1], [1], [0, 0, 0, 1, 1, 1], [0], [0]>} : vector<1x16x32xf32>, vector<1x16x32xf32>, vector<1x16x16xf32> -> vector<1x16x16xf32>
    "tpu.trace_stop"() : () -> ()
    %cst_31 = arith.constant 1.000000e-24 : f32
    %77 = vector.broadcast %cst_31 : f32 to vector<1x16x16xf32>
    %78 = arith.maximumf %76, %77 : vector<1x16x16xf32>
    %79 = math.rsqrt %78 : vector<1x16x16xf32>
    %80 = arith.mulf %73, %79 : vector<1x16x16xf32>
    %81 = vector.broadcast %0 : f32 to vector<1x16x16xf32>
    %82 = arith.addf %80, %81 : vector<1x16x16xf32>
    %cst_32 = arith.constant dense<0xFF800000> : vector<1x16xf32>
    %83 = vector.multi_reduction <maximumf>, %82, %cst_32 [2] : vector<1x16x16xf32> to vector<1x16xf32>
    %84 = vector.shape_cast %83 : vector<1x16xf32> to vector<1x16x1xf32>
    %85 = vector.broadcast %84 : vector<1x16x1xf32> to vector<1x16x16xf32>
    %86 = arith.subf %82, %85 : vector<1x16x16xf32>
    %87 = math.exp %86 : vector<1x16x16xf32>
    %cst_33 = arith.constant dense<0.000000e+00> : vector<1x16xf32>
    %88 = vector.multi_reduction <add>, %87, %cst_33 [2] : vector<1x16x16xf32> to vector<1x16xf32>
    %89 = vector.shape_cast %88 : vector<1x16xf32> to vector<1x16x1xf32>
    %90 = vector.broadcast %89 : vector<1x16x1xf32> to vector<1x16x16xf32>
    %91 = arith.divf %87, %90 : vector<1x16x16xf32>
    %92 = vector.extract_strided_slice %91 {offsets = [0, 0, 0], sizes = [1, 8, 16], strides = [1, 1, 1]} : vector<1x16x16xf32> to vector<1x8x16xf32>
    %93 = vector.extract_strided_slice %91 {offsets = [0, 8, 0], sizes = [1, 1, 16], strides = [1, 1, 1]} : vector<1x16x16xf32> to vector<1x1x16xf32>
    %94 = arith.mulf %39, %39 : vector<1x8x32xf32>
    %cst_34 = arith.constant dense<0.000000e+00> : vector<1x8xf32>
    %95 = vector.multi_reduction <add>, %94, %cst_34 [2] : vector<1x8x32xf32> to vector<1x8xf32>
    %96 = vector.shape_cast %95 : vector<1x8xf32> to vector<1x8x1xf32>
    %97 = math.sqrt %96 : vector<1x8x1xf32>
    %cst_35 = arith.constant 9.99999996E-13 : f32
    %98 = vector.broadcast %cst_35 : f32 to vector<1x8x1xf32>
    %99 = arith.maximumf %97, %98 : vector<1x8x1xf32>
    %100 = vector.broadcast %99 : vector<1x8x1xf32> to vector<1x8x32xf32>
    %101 = arith.divf %39, %100 : vector<1x8x32xf32>
    %c0_36 = arith.constant 0 : index
    %c0_37 = arith.constant 0 : index
    %102 = vector.load %arg12[%c0_36, %c0_37] : memref<1x32xf32, #tpu.memory_space<vmem>>, vector<1x32xf32>
    %103 = vector.shape_cast %102 : vector<1x32xf32> to vector<1x1x32xf32>
    %104 = vector.broadcast %103 : vector<1x1x32xf32> to vector<1x8x32xf32>
    %105 = arith.mulf %101, %104 : vector<1x8x32xf32>
    %cst_38 = arith.constant dense<0.000000e+00> : vector<1x8xf32>
    %106 = vector.multi_reduction <add>, %105, %cst_38 [2] : vector<1x8x32xf32> to vector<1x8xf32>
    %107 = vector.shape_cast %106 : vector<1x8xf32> to vector<1x8x1xf32>
    %108 = vector.broadcast %3 : f32 to vector<1x8x1xf32>
    %109 = arith.addf %107, %108 : vector<1x8x1xf32>
    %cst_39 = arith.constant 0.000000e+00 : f32
    %110 = vector.broadcast %cst_39 : f32 to vector<1x8x1xf32>
    %111 = arith.cmpf oge, %109, %110 : vector<1x8x1xf32>
    %112 = arith.extui %111 : vector<1x8x1xi1> to vector<1x8x1xi32>
    %113 = arith.sitofp %112 : vector<1x8x1xi32> to vector<1x8x1xf32>
    %cst_40 = arith.constant 1.000000e+00 : f32
    %114 = vector.broadcast %cst_40 : f32 to vector<1x8x1xf32>
    %115 = arith.subf %114, %113 : vector<1x8x1xf32>
    %116 = arith.negf %109 : vector<1x8x1xf32>
    %117 = math.exp %116 : vector<1x8x1xf32>
    %cst_41 = arith.constant 1.000000e+00 : f32
    %118 = vector.broadcast %cst_41 : f32 to vector<1x8x1xf32>
    %119 = arith.addf %118, %117 : vector<1x8x1xf32>
    %120 = arith.divf %118, %119 : vector<1x8x1xf32>
    %121 = arith.mulf %115, %120 : vector<1x8x1xf32>
    %122 = arith.addf %113, %121 : vector<1x8x1xf32>
    %cst_42 = arith.constant 1.000000e+00 : f32
    %123 = vector.broadcast %cst_42 : f32 to vector<1x8x1xf32>
    %124 = arith.subf %123, %120 : vector<1x8x1xf32>
    %125 = arith.mulf %115, %124 : vector<1x8x1xf32>
    %c0_43 = arith.constant 0 : index
    %c0_44 = arith.constant 0 : index
    %126 = vector.load %arg14[%c0_43, %c0_44] : memref<1x32xf32, #tpu.memory_space<vmem>>, vector<1x32xf32>
    %127 = vector.shape_cast %126 : vector<1x32xf32> to vector<1x1x32xf32>
    %128 = vector.broadcast %127 : vector<1x1x32xf32> to vector<1x8x32xf32>
    %129 = arith.mulf %58, %128 : vector<1x8x32xf32>
    %cst_45 = arith.constant dense<0.000000e+00> : vector<1x8xf32>
    %130 = vector.multi_reduction <add>, %129, %cst_45 [2] : vector<1x8x32xf32> to vector<1x8xf32>
    %131 = vector.shape_cast %130 : vector<1x8xf32> to vector<1x8x1xf32>
    %c0_46 = arith.constant 0 : index
    %c0_47 = arith.constant 0 : index
    %132 = vector.load %arg13[%c0_46, %c0_47] : memref<1x32xf32, #tpu.memory_space<vmem>>, vector<1x32xf32>
    %133 = vector.shape_cast %132 : vector<1x32xf32> to vector<1x1x32xf32>
    "tpu.trace_start"() <{level = 10 : i32, message = "bxh,bjh->bxj"}> : () -> ()
    %cst_48 = arith.constant dense<0.000000e+00> : vector<1x1x8xf32>
    %134 = tpu.matmul %133, %68, %cst_48 {dimension_numbers = #tpu.dot_dimension_numbers<[2], [2], [1], [1], [0, 0, 0, 1, 1, 1], [0], [0]>} : vector<1x1x32xf32>, vector<1x8x32xf32>, vector<1x1x8xf32> -> vector<1x1x8xf32>
    "tpu.trace_stop"() : () -> ()
    %135 = tpu.iota {dimensions = array<i32: 0>} : vector<8x8xi32>
    %136 = tpu.iota {dimensions = array<i32: 1>} : vector<8x8xi32>
    %137 = arith.cmpi sle, %136, %135 : vector<8x8xi32>
    %138 = arith.subi %135, %136 : vector<8x8xi32>
    %c1_i32 = arith.constant 1 : i32
    %139 = vector.broadcast %c1_i32 : i32 to vector<8x8xi32>
    %140 = arith.addi %138, %139 : vector<8x8xi32>
    %141 = arith.sitofp %140 : vector<8x8xi32> to vector<8x8xf32>
    %cst_49 = arith.constant 0.000000e+00 : f32
    %142 = vector.broadcast %cst_49 : f32 to vector<8x8xf32>
    %143 = arith.select %137, %141, %142 : vector<8x8xi1>, vector<8x8xf32>
    %144 = vector.broadcast %131 : vector<1x8x1xf32> to vector<1x8x8xf32>
    %145 = vector.broadcast %134 : vector<1x1x8xf32> to vector<1x8x8xf32>
    %146 = arith.addf %144, %145 : vector<1x8x8xf32>
    %147 = vector.broadcast %1 : f32 to vector<8x8xf32>
    %148 = arith.mulf %147, %143 : vector<8x8xf32>
    %149 = vector.broadcast %2 : f32 to vector<8x8xf32>
    %150 = arith.addf %148, %149 : vector<8x8xf32>
    %151 = vector.shape_cast %150 : vector<8x8xf32> to vector<1x8x8xf32>
    %152 = arith.addf %146, %151 : vector<1x8x8xf32>
    %153 = vector.shape_cast %137 : vector<8x8xi1> to vector<1x8x8xi1>
    %cst_50 = arith.constant 0xFF800000 : f32
    %154 = vector.broadcast %cst_50 : f32 to vector<1x8x8xf32>
    %155 = arith.select %153, %152, %154 : vector<1x8x8xi1>, vector<1x8x8xf32>
    %cst_51 = arith.constant dense<0xFF800000> : vector<1x8xf32>
    %156 = vector.multi_reduction <maximumf>, %155, %cst_51 [2] : vector<1x8x8xf32> to vector<1x8xf32>
    %157 = vector.shape_cast %156 : vector<1x8xf32> to vector<1x8x1xf32>
    %158 = vector.broadcast %157 : vector<1x8x1xf32> to vector<1x8x8xf32>
    %159 = arith.cmpf oeq, %155, %158 : vector<1x8x8xf32>
    %160 = vector.shape_cast %136 : vector<8x8xi32> to vector<1x8x8xi32>
    %c9_i32 = arith.constant 9 : i32
    %161 = vector.broadcast %c9_i32 : i32 to vector<1x8x8xi32>
    %162 = arith.select %159, %160, %161 : vector<1x8x8xi1>, vector<1x8x8xi32>
    %cst_52 = arith.constant dense<2147483647> : vector<1x8xi32>
    %163 = vector.multi_reduction <minsi>, %162, %cst_52 [2] : vector<1x8x8xi32> to vector<1x8xi32>
    %164 = vector.shape_cast %163 : vector<1x8xi32> to vector<1x8x1xi32>
    %165 = vector.shape_cast %136 : vector<8x8xi32> to vector<1x8x8xi32>
    %166 = vector.broadcast %164 : vector<1x8x1xi32> to vector<1x8x8xi32>
    %167 = arith.cmpi eq, %165, %166 : vector<1x8x8xi32>
    %168 = arith.extui %167 : vector<1x8x8xi1> to vector<1x8x8xi32>
    %169 = arith.sitofp %168 : vector<1x8x8xi32> to vector<1x8x8xf32>
    %c0_53 = arith.constant 0 : index
    %c0_54 = arith.constant 0 : index
    %c16 = arith.constant 16 : index
    %170 = vector.load %arg15[%c0_53, %c0_54, %c16] : memref<1x8x42xf32, #tpu.memory_space<vmem>>, vector<1x8x16xf32>
    tpu.vector_store %arg15[%c0_53, %c0_54, %c16], %92 {strides = array<i32>} : memref<1x8x42xf32, #tpu.memory_space<vmem>>, vector<1x8x16xf32>,
    %c0_55 = arith.constant 0 : index
    %c0_56 = arith.constant 0 : index
    %c32 = arith.constant 32 : index
    %171 = vector.load %arg15[%c0_55, %c0_56, %c32] : memref<1x8x42xf32, #tpu.memory_space<vmem>>, vector<1x8x8xf32>
    tpu.vector_store %arg15[%c0_55, %c0_56, %c32], %169 {strides = array<i32>} : memref<1x8x42xf32, #tpu.memory_space<vmem>>, vector<1x8x8xf32>,
    %c0_57 = arith.constant 0 : index
    %c0_58 = arith.constant 0 : index
    %c40 = arith.constant 40 : index
    %172 = vector.load %arg15[%c0_57, %c0_58, %c40] : memref<1x8x42xf32, #tpu.memory_space<vmem>>, vector<1x8x1xf32>
    tpu.vector_store %arg15[%c0_57, %c0_58, %c40], %113 {strides = array<i32>} : memref<1x8x42xf32, #tpu.memory_space<vmem>>, vector<1x8x1xf32>,
    %c0_59 = arith.constant 0 : index
    %c0_60 = arith.constant 0 : index
    %c41 = arith.constant 41 : index
    %173 = vector.load %arg15[%c0_59, %c0_60, %c41] : memref<1x8x42xf32, #tpu.memory_space<vmem>>, vector<1x8x1xf32>
    tpu.vector_store %arg15[%c0_59, %c0_60, %c41], %115 {strides = array<i32>} : memref<1x8x42xf32, #tpu.memory_space<vmem>>, vector<1x8x1xf32>,
    %cst_61 = arith.constant 0.000000e+00 : f32
    %174 = vector.broadcast %cst_61 : f32 to vector<1x8x16xf32>
    %c0_62 = arith.constant 0 : index
    %c0_63 = arith.constant 0 : index
    %c0_64 = arith.constant 0 : index
    %175 = vector.load %arg16[%c0_62, %c0_63, %c0_64] : memref<1x8x16xf32, #tpu.memory_space<vmem>>, vector<1x8x16xf32>
    tpu.vector_store %arg16[%c0_62, %c0_63, %c0_64], %174 {strides = array<i32>} : memref<1x8x16xf32, #tpu.memory_space<vmem>>, vector<1x8x16xf32>,
    %c0_65 = arith.constant 0 : index
    %c0_66 = arith.constant 0 : index
    %c0_67 = arith.constant 0 : index
    %176 = vector.load %arg16[%c0_65, %c0_66, %c0_67] : memref<1x8x16xf32, #tpu.memory_space<vmem>>, vector<1x1x16xf32>
    tpu.vector_store %arg16[%c0_65, %c0_66, %c0_67], %93 {strides = array<i32>} : memref<1x8x16xf32, #tpu.memory_space<vmem>>, vector<1x1x16xf32>,
    %177 = vector.extract_strided_slice %169 {offsets = [0, 0, 0], sizes = [1, 1, 8], strides = [1, 1, 1]} : vector<1x8x8xf32> to vector<1x1x8xf32>
    %c0_68 = arith.constant 0 : index
    %c0_69 = arith.constant 0 : index
    %c0_70 = arith.constant 0 : index
    %178 = vector.load %arg16[%c0_68, %c0_69, %c0_70] : memref<1x8x16xf32, #tpu.memory_space<vmem>>, vector<1x8x16xf32>
    "tpu.trace_start"() <{level = 10 : i32, message = "bxj,bjp->bxp"}> : () -> ()
    %cst_71 = arith.constant dense<0.000000e+00> : vector<1x1x16xf32>
    %179 = tpu.matmul %177, %178, %cst_71 {dimension_numbers = #tpu.dot_dimension_numbers<[2], [1], [1], [2], [0, 0, 0, 1, 1, 2], [0], [0]>} : vector<1x1x8xf32>, vector<1x8x16xf32>, vector<1x1x16xf32> -> vector<1x1x16xf32>
    "tpu.trace_stop"() : () -> ()
    %180 = vector.extract_strided_slice %122 {offsets = [0, 0, 0], sizes = [1, 1, 1], strides = [1, 1, 1]} : vector<1x8x1xf32> to vector<1x1x1xf32>
    %181 = vector.extract_strided_slice %92 {offsets = [0, 0, 0], sizes = [1, 1, 16], strides = [1, 1, 1]} : vector<1x8x16xf32> to vector<1x1x16xf32>
    %182 = vector.broadcast %180 : vector<1x1x1xf32> to vector<1x1x16xf32>
    %183 = arith.mulf %182, %181 : vector<1x1x16xf32>
    %184 = vector.extract_strided_slice %125 {offsets = [0, 0, 0], sizes = [1, 1, 1], strides = [1, 1, 1]} : vector<1x8x1xf32> to vector<1x1x1xf32>
    %185 = vector.broadcast %184 : vector<1x1x1xf32> to vector<1x1x16xf32>
    %186 = arith.mulf %185, %179 : vector<1x1x16xf32>
    %187 = arith.addf %183, %186 : vector<1x1x16xf32>
    %c0_72 = arith.constant 0 : index
    %c0_73 = arith.constant 0 : index
    %c0_74 = arith.constant 0 : index
    %188 = vector.load %arg15[%c0_72, %c0_73, %c0_74] : memref<1x8x42xf32, #tpu.memory_space<vmem>>, vector<1x1x16xf32>
    tpu.vector_store %arg15[%c0_72, %c0_73, %c0_74], %187 {strides = array<i32>} : memref<1x8x42xf32, #tpu.memory_space<vmem>>, vector<1x1x16xf32>,
    %c0_75 = arith.constant 0 : index
    %c1_76 = arith.constant 1 : index
    %c0_77 = arith.constant 0 : index
    %189 = vector.load %arg16[%c0_75, %c1_76, %c0_77] : memref<1x8x16xf32, #tpu.memory_space<vmem>>, vector<1x1x16xf32>
    tpu.vector_store %arg16[%c0_75, %c1_76, %c0_77], %187 {strides = array<i32>} : memref<1x8x16xf32, #tpu.memory_space<vmem>>, vector<1x1x16xf32>,
    %190 = vector.extract_strided_slice %169 {offsets = [0, 1, 0], sizes = [1, 1, 8], strides = [1, 1, 1]} : vector<1x8x8xf32> to vector<1x1x8xf32>
    %c0_78 = arith.constant 0 : index
    %c0_79 = arith.constant 0 : index
    %c0_80 = arith.constant 0 : index
    %191 = vector.load %arg16[%c0_78, %c0_79, %c0_80] : memref<1x8x16xf32, #tpu.memory_space<vmem>>, vector<1x8x16xf32>
    "tpu.trace_start"() <{level = 10 : i32, message = "bxj,bjp->bxp"}> : () -> ()
    %cst_81 = arith.constant dense<0.000000e+00> : vector<1x1x16xf32>
    %192 = tpu.matmul %190, %191, %cst_81 {dimension_numbers = #tpu.dot_dimension_numbers<[2], [1], [1], [2], [0, 0, 0, 1, 1, 2], [0], [0]>} : vector<1x1x8xf32>, vector<1x8x16xf32>, vector<1x1x16xf32> -> vector<1x1x16xf32>
    "tpu.trace_stop"() : () -> ()
    %193 = vector.extract_strided_slice %122 {offsets = [0, 1, 0], sizes = [1, 1, 1], strides = [1, 1, 1]} : vector<1x8x1xf32> to vector<1x1x1xf32>
    %194 = vector.extract_strided_slice %92 {offsets = [0, 1, 0], sizes = [1, 1, 16], strides = [1, 1, 1]} : vector<1x8x16xf32> to vector<1x1x16xf32>
    %195 = vector.broadcast %193 : vector<1x1x1xf32> to vector<1x1x16xf32>
    %196 = arith.mulf %195, %194 : vector<1x1x16xf32>
    %197 = vector.extract_strided_slice %125 {offsets = [0, 1, 0], sizes = [1, 1, 1], strides = [1, 1, 1]} : vector<1x8x1xf32> to vector<1x1x1xf32>
    %198 = vector.broadcast %197 : vector<1x1x1xf32> to vector<1x1x16xf32>
    %199 = arith.mulf %198, %192 : vector<1x1x16xf32>
    %200 = arith.addf %196, %199 : vector<1x1x16xf32>
    %c0_82 = arith.constant 0 : index
    %c1_83 = arith.constant 1 : index
    %c0_84 = arith.constant 0 : index
    %201 = vector.load %arg15[%c0_82, %c1_83, %c0_84] : memref<1x8x42xf32, #tpu.memory_space<vmem>>, vector<1x1x16xf32>
    tpu.vector_store %arg15[%c0_82, %c1_83, %c0_84], %200 {strides = array<i32>} : memref<1x8x42xf32, #tpu.memory_space<vmem>>, vector<1x1x16xf32>,
    %c0_85 = arith.constant 0 : index
    %c2_86 = arith.constant 2 : index
    %c0_87 = arith.constant 0 : index
    %202 = vector.load %arg16[%c0_85, %c2_86, %c0_87] : memref<1x8x16xf32, #tpu.memory_space<vmem>>, vector<1x1x16xf32>
    tpu.vector_store %arg16[%c0_85, %c2_86, %c0_87], %200 {strides = array<i32>} : memref<1x8x16xf32, #tpu.memory_space<vmem>>, vector<1x1x16xf32>,
    %203 = vector.extract_strided_slice %169 {offsets = [0, 2, 0], sizes = [1, 1, 8], strides = [1, 1, 1]} : vector<1x8x8xf32> to vector<1x1x8xf32>
    %c0_88 = arith.constant 0 : index
    %c0_89 = arith.constant 0 : index
    %c0_90 = arith.constant 0 : index
    %204 = vector.load %arg16[%c0_88, %c0_89, %c0_90] : memref<1x8x16xf32, #tpu.memory_space<vmem>>, vector<1x8x16xf32>
    "tpu.trace_start"() <{level = 10 : i32, message = "bxj,bjp->bxp"}> : () -> ()
    %cst_91 = arith.constant dense<0.000000e+00> : vector<1x1x16xf32>
    %205 = tpu.matmul %203, %204, %cst_91 {dimension_numbers = #tpu.dot_dimension_numbers<[2], [1], [1], [2], [0, 0, 0, 1, 1, 2], [0], [0]>} : vector<1x1x8xf32>, vector<1x8x16xf32>, vector<1x1x16xf32> -> vector<1x1x16xf32>
    "tpu.trace_stop"() : () -> ()
    %206 = vector.extract_strided_slice %122 {offsets = [0, 2, 0], sizes = [1, 1, 1], strides = [1, 1, 1]} : vector<1x8x1xf32> to vector<1x1x1xf32>
    %207 = vector.extract_strided_slice %92 {offsets = [0, 2, 0], sizes = [1, 1, 16], strides = [1, 1, 1]} : vector<1x8x16xf32> to vector<1x1x16xf32>
    %208 = vector.broadcast %206 : vector<1x1x1xf32> to vector<1x1x16xf32>
    %209 = arith.mulf %208, %207 : vector<1x1x16xf32>
    %210 = vector.extract_strided_slice %125 {offsets = [0, 2, 0], sizes = [1, 1, 1], strides = [1, 1, 1]} : vector<1x8x1xf32> to vector<1x1x1xf32>
    %211 = vector.broadcast %210 : vector<1x1x1xf32> to vector<1x1x16xf32>
    %212 = arith.mulf %211, %205 : vector<1x1x16xf32>
    %213 = arith.addf %209, %212 : vector<1x1x16xf32>
    %c0_92 = arith.constant 0 : index
    %c2_93 = arith.constant 2 : index
    %c0_94 = arith.constant 0 : index
    %214 = vector.load %arg15[%c0_92, %c2_93, %c0_94] : memref<1x8x42xf32, #tpu.memory_space<vmem>>, vector<1x1x16xf32>
    tpu.vector_store %arg15[%c0_92, %c2_93, %c0_94], %213 {strides = array<i32>} : memref<1x8x42xf32, #tpu.memory_space<vmem>>, vector<1x1x16xf32>,
    %c0_95 = arith.constant 0 : index
    %c3_96 = arith.constant 3 : index
    %c0_97 = arith.constant 0 : index
    %215 = vector.load %arg16[%c0_95, %c3_96, %c0_97] : memref<1x8x16xf32, #tpu.memory_space<vmem>>, vector<1x1x16xf32>
    tpu.vector_store %arg16[%c0_95, %c3_96, %c0_97], %213 {strides = array<i32>} : memref<1x8x16xf32, #tpu.memory_space<vmem>>, vector<1x1x16xf32>,
    %216 = vector.extract_strided_slice %169 {offsets = [0, 3, 0], sizes = [1, 1, 8], strides = [1, 1, 1]} : vector<1x8x8xf32> to vector<1x1x8xf32>
    %c0_98 = arith.constant 0 : index
    %c0_99 = arith.constant 0 : index
    %c0_100 = arith.constant 0 : index
    %217 = vector.load %arg16[%c0_98, %c0_99, %c0_100] : memref<1x8x16xf32, #tpu.memory_space<vmem>>, vector<1x8x16xf32>
    "tpu.trace_start"() <{level = 10 : i32, message = "bxj,bjp->bxp"}> : () -> ()
    %cst_101 = arith.constant dense<0.000000e+00> : vector<1x1x16xf32>
    %218 = tpu.matmul %216, %217, %cst_101 {dimension_numbers = #tpu.dot_dimension_numbers<[2], [1], [1], [2], [0, 0, 0, 1, 1, 2], [0], [0]>} : vector<1x1x8xf32>, vector<1x8x16xf32>, vector<1x1x16xf32> -> vector<1x1x16xf32>
    "tpu.trace_stop"() : () -> ()
    %219 = vector.extract_strided_slice %122 {offsets = [0, 3, 0], sizes = [1, 1, 1], strides = [1, 1, 1]} : vector<1x8x1xf32> to vector<1x1x1xf32>
    %220 = vector.extract_strided_slice %92 {offsets = [0, 3, 0], sizes = [1, 1, 16], strides = [1, 1, 1]} : vector<1x8x16xf32> to vector<1x1x16xf32>
    %221 = vector.broadcast %219 : vector<1x1x1xf32> to vector<1x1x16xf32>
    %222 = arith.mulf %221, %220 : vector<1x1x16xf32>
    %223 = vector.extract_strided_slice %125 {offsets = [0, 3, 0], sizes = [1, 1, 1], strides = [1, 1, 1]} : vector<1x8x1xf32> to vector<1x1x1xf32>
    %224 = vector.broadcast %223 : vector<1x1x1xf32> to vector<1x1x16xf32>
    %225 = arith.mulf %224, %218 : vector<1x1x16xf32>
    %226 = arith.addf %222, %225 : vector<1x1x16xf32>
    %c0_102 = arith.constant 0 : index
    %c3_103 = arith.constant 3 : index
    %c0_104 = arith.constant 0 : index
    %227 = vector.load %arg15[%c0_102, %c3_103, %c0_104] : memref<1x8x42xf32, #tpu.memory_space<vmem>>, vector<1x1x16xf32>
    tpu.vector_store %arg15[%c0_102, %c3_103, %c0_104], %226 {strides = array<i32>} : memref<1x8x42xf32, #tpu.memory_space<vmem>>, vector<1x1x16xf32>,
    %c0_105 = arith.constant 0 : index
    %c4 = arith.constant 4 : index
    %c0_106 = arith.constant 0 : index
    %228 = vector.load %arg16[%c0_105, %c4, %c0_106] : memref<1x8x16xf32, #tpu.memory_space<vmem>>, vector<1x1x16xf32>
    tpu.vector_store %arg16[%c0_105, %c4, %c0_106], %226 {strides = array<i32>} : memref<1x8x16xf32, #tpu.memory_space<vmem>>, vector<1x1x16xf32>,
    %229 = vector.extract_strided_slice %169 {offsets = [0, 4, 0], sizes = [1, 1, 8], strides = [1, 1, 1]} : vector<1x8x8xf32> to vector<1x1x8xf32>
    %c0_107 = arith.constant 0 : index
    %c0_108 = arith.constant 0 : index
    %c0_109 = arith.constant 0 : index
    %230 = vector.load %arg16[%c0_107, %c0_108, %c0_109] : memref<1x8x16xf32, #tpu.memory_space<vmem>>, vector<1x8x16xf32>
    "tpu.trace_start"() <{level = 10 : i32, message = "bxj,bjp->bxp"}> : () -> ()
    %cst_110 = arith.constant dense<0.000000e+00> : vector<1x1x16xf32>
    %231 = tpu.matmul %229, %230, %cst_110 {dimension_numbers = #tpu.dot_dimension_numbers<[2], [1], [1], [2], [0, 0, 0, 1, 1, 2], [0], [0]>} : vector<1x1x8xf32>, vector<1x8x16xf32>, vector<1x1x16xf32> -> vector<1x1x16xf32>
    "tpu.trace_stop"() : () -> ()
    %232 = vector.extract_strided_slice %122 {offsets = [0, 4, 0], sizes = [1, 1, 1], strides = [1, 1, 1]} : vector<1x8x1xf32> to vector<1x1x1xf32>
    %233 = vector.extract_strided_slice %92 {offsets = [0, 4, 0], sizes = [1, 1, 16], strides = [1, 1, 1]} : vector<1x8x16xf32> to vector<1x1x16xf32>
    %234 = vector.broadcast %232 : vector<1x1x1xf32> to vector<1x1x16xf32>
    %235 = arith.mulf %234, %233 : vector<1x1x16xf32>
    %236 = vector.extract_strided_slice %125 {offsets = [0, 4, 0], sizes = [1, 1, 1], strides = [1, 1, 1]} : vector<1x8x1xf32> to vector<1x1x1xf32>
    %237 = vector.broadcast %236 : vector<1x1x1xf32> to vector<1x1x16xf32>
    %238 = arith.mulf %237, %231 : vector<1x1x16xf32>
    %239 = arith.addf %235, %238 : vector<1x1x16xf32>
    %c0_111 = arith.constant 0 : index
    %c4_112 = arith.constant 4 : index
    %c0_113 = arith.constant 0 : index
    %240 = vector.load %arg15[%c0_111, %c4_112, %c0_113] : memref<1x8x42xf32, #tpu.memory_space<vmem>>, vector<1x1x16xf32>
    tpu.vector_store %arg15[%c0_111, %c4_112, %c0_113], %239 {strides = array<i32>} : memref<1x8x42xf32, #tpu.memory_space<vmem>>, vector<1x1x16xf32>,
    %c0_114 = arith.constant 0 : index
    %c5 = arith.constant 5 : index
    %c0_115 = arith.constant 0 : index
    %241 = vector.load %arg16[%c0_114, %c5, %c0_115] : memref<1x8x16xf32, #tpu.memory_space<vmem>>, vector<1x1x16xf32>
    tpu.vector_store %arg16[%c0_114, %c5, %c0_115], %239 {strides = array<i32>} : memref<1x8x16xf32, #tpu.memory_space<vmem>>, vector<1x1x16xf32>,
    %242 = vector.extract_strided_slice %169 {offsets = [0, 5, 0], sizes = [1, 1, 8], strides = [1, 1, 1]} : vector<1x8x8xf32> to vector<1x1x8xf32>
    %c0_116 = arith.constant 0 : index
    %c0_117 = arith.constant 0 : index
    %c0_118 = arith.constant 0 : index
    %243 = vector.load %arg16[%c0_116, %c0_117, %c0_118] : memref<1x8x16xf32, #tpu.memory_space<vmem>>, vector<1x8x16xf32>
    "tpu.trace_start"() <{level = 10 : i32, message = "bxj,bjp->bxp"}> : () -> ()
    %cst_119 = arith.constant dense<0.000000e+00> : vector<1x1x16xf32>
    %244 = tpu.matmul %242, %243, %cst_119 {dimension_numbers = #tpu.dot_dimension_numbers<[2], [1], [1], [2], [0, 0, 0, 1, 1, 2], [0], [0]>} : vector<1x1x8xf32>, vector<1x8x16xf32>, vector<1x1x16xf32> -> vector<1x1x16xf32>
    "tpu.trace_stop"() : () -> ()
    %245 = vector.extract_strided_slice %122 {offsets = [0, 5, 0], sizes = [1, 1, 1], strides = [1, 1, 1]} : vector<1x8x1xf32> to vector<1x1x1xf32>
    %246 = vector.extract_strided_slice %92 {offsets = [0, 5, 0], sizes = [1, 1, 16], strides = [1, 1, 1]} : vector<1x8x16xf32> to vector<1x1x16xf32>
    %247 = vector.broadcast %245 : vector<1x1x1xf32> to vector<1x1x16xf32>
    %248 = arith.mulf %247, %246 : vector<1x1x16xf32>
    %249 = vector.extract_strided_slice %125 {offsets = [0, 5, 0], sizes = [1, 1, 1], strides = [1, 1, 1]} : vector<1x8x1xf32> to vector<1x1x1xf32>
    %250 = vector.broadcast %249 : vector<1x1x1xf32> to vector<1x1x16xf32>
    %251 = arith.mulf %250, %244 : vector<1x1x16xf32>
    %252 = arith.addf %248, %251 : vector<1x1x16xf32>
    %c0_120 = arith.constant 0 : index
    %c5_121 = arith.constant 5 : index
    %c0_122 = arith.constant 0 : index
    %253 = vector.load %arg15[%c0_120, %c5_121, %c0_122] : memref<1x8x42xf32, #tpu.memory_space<vmem>>, vector<1x1x16xf32>
    tpu.vector_store %arg15[%c0_120, %c5_121, %c0_122], %252 {strides = array<i32>} : memref<1x8x42xf32, #tpu.memory_space<vmem>>, vector<1x1x16xf32>,
    %c0_123 = arith.constant 0 : index
    %c6 = arith.constant 6 : index
    %c0_124 = arith.constant 0 : index
    %254 = vector.load %arg16[%c0_123, %c6, %c0_124] : memref<1x8x16xf32, #tpu.memory_space<vmem>>, vector<1x1x16xf32>
    tpu.vector_store %arg16[%c0_123, %c6, %c0_124], %252 {strides = array<i32>} : memref<1x8x16xf32, #tpu.memory_space<vmem>>, vector<1x1x16xf32>,
    %255 = vector.extract_strided_slice %169 {offsets = [0, 6, 0], sizes = [1, 1, 8], strides = [1, 1, 1]} : vector<1x8x8xf32> to vector<1x1x8xf32>
    %c0_125 = arith.constant 0 : index
    %c0_126 = arith.constant 0 : index
    %c0_127 = arith.constant 0 : index
    %256 = vector.load %arg16[%c0_125, %c0_126, %c0_127] : memref<1x8x16xf32, #tpu.memory_space<vmem>>, vector<1x8x16xf32>
    "tpu.trace_start"() <{level = 10 : i32, message = "bxj,bjp->bxp"}> : () -> ()
    %cst_128 = arith.constant dense<0.000000e+00> : vector<1x1x16xf32>
    %257 = tpu.matmul %255, %256, %cst_128 {dimension_numbers = #tpu.dot_dimension_numbers<[2], [1], [1], [2], [0, 0, 0, 1, 1, 2], [0], [0]>} : vector<1x1x8xf32>, vector<1x8x16xf32>, vector<1x1x16xf32> -> vector<1x1x16xf32>
    "tpu.trace_stop"() : () -> ()
    %258 = vector.extract_strided_slice %122 {offsets = [0, 6, 0], sizes = [1, 1, 1], strides = [1, 1, 1]} : vector<1x8x1xf32> to vector<1x1x1xf32>
    %259 = vector.extract_strided_slice %92 {offsets = [0, 6, 0], sizes = [1, 1, 16], strides = [1, 1, 1]} : vector<1x8x16xf32> to vector<1x1x16xf32>
    %260 = vector.broadcast %258 : vector<1x1x1xf32> to vector<1x1x16xf32>
    %261 = arith.mulf %260, %259 : vector<1x1x16xf32>
    %262 = vector.extract_strided_slice %125 {offsets = [0, 6, 0], sizes = [1, 1, 1], strides = [1, 1, 1]} : vector<1x8x1xf32> to vector<1x1x1xf32>
    %263 = vector.broadcast %262 : vector<1x1x1xf32> to vector<1x1x16xf32>
    %264 = arith.mulf %263, %257 : vector<1x1x16xf32>
    %265 = arith.addf %261, %264 : vector<1x1x16xf32>
    %c0_129 = arith.constant 0 : index
    %c6_130 = arith.constant 6 : index
    %c0_131 = arith.constant 0 : index
    %266 = vector.load %arg15[%c0_129, %c6_130, %c0_131] : memref<1x8x42xf32, #tpu.memory_space<vmem>>, vector<1x1x16xf32>
    tpu.vector_store %arg15[%c0_129, %c6_130, %c0_131], %265 {strides = array<i32>} : memref<1x8x42xf32, #tpu.memory_space<vmem>>, vector<1x1x16xf32>,
    %c0_132 = arith.constant 0 : index
    %c7 = arith.constant 7 : index
    %c0_133 = arith.constant 0 : index
    %267 = vector.load %arg16[%c0_132, %c7, %c0_133] : memref<1x8x16xf32, #tpu.memory_space<vmem>>, vector<1x1x16xf32>
    tpu.vector_store %arg16[%c0_132, %c7, %c0_133], %265 {strides = array<i32>} : memref<1x8x16xf32, #tpu.memory_space<vmem>>, vector<1x1x16xf32>,
    %268 = vector.extract_strided_slice %169 {offsets = [0, 7, 0], sizes = [1, 1, 8], strides = [1, 1, 1]} : vector<1x8x8xf32> to vector<1x1x8xf32>
    %c0_134 = arith.constant 0 : index
    %c0_135 = arith.constant 0 : index
    %c0_136 = arith.constant 0 : index
    %269 = vector.load %arg16[%c0_134, %c0_135, %c0_136] : memref<1x8x16xf32, #tpu.memory_space<vmem>>, vector<1x8x16xf32>
    "tpu.trace_start"() <{level = 10 : i32, message = "bxj,bjp->bxp"}> : () -> ()
    %cst_137 = arith.constant dense<0.000000e+00> : vector<1x1x16xf32>
    %270 = tpu.matmul %268, %269, %cst_137 {dimension_numbers = #tpu.dot_dimension_numbers<[2], [1], [1], [2], [0, 0, 0, 1, 1, 2], [0], [0]>} : vector<1x1x8xf32>, vector<1x8x16xf32>, vector<1x1x16xf32> -> vector<1x1x16xf32>
    "tpu.trace_stop"() : () -> ()
    %271 = vector.extract_strided_slice %122 {offsets = [0, 7, 0], sizes = [1, 1, 1], strides = [1, 1, 1]} : vector<1x8x1xf32> to vector<1x1x1xf32>
    %272 = vector.extract_strided_slice %92 {offsets = [0, 7, 0], sizes = [1, 1, 16], strides = [1, 1, 1]} : vector<1x8x16xf32> to vector<1x1x16xf32>
    %273 = vector.broadcast %271 : vector<1x1x1xf32> to vector<1x1x16xf32>
    %274 = arith.mulf %273, %272 : vector<1x1x16xf32>
    %275 = vector.extract_strided_slice %125 {offsets = [0, 7, 0], sizes = [1, 1, 1], strides = [1, 1, 1]} : vector<1x8x1xf32> to vector<1x1x1xf32>
    %276 = vector.broadcast %275 : vector<1x1x1xf32> to vector<1x1x16xf32>
    %277 = arith.mulf %276, %270 : vector<1x1x16xf32>
    %278 = arith.addf %274, %277 : vector<1x1x16xf32>
    %c0_138 = arith.constant 0 : index
    %c7_139 = arith.constant 7 : index
    %c0_140 = arith.constant 0 : index
    %279 = vector.load %arg15[%c0_138, %c7_139, %c0_140] : memref<1x8x42xf32, #tpu.memory_space<vmem>>, vector<1x1x16xf32>
    tpu.vector_store %arg15[%c0_138, %c7_139, %c0_140], %278 {strides = array<i32>} : memref<1x8x42xf32, #tpu.memory_space<vmem>>, vector<1x1x16xf32>,
    return
  }
  func.func @transform_0(%arg0: i32) -> i32 {
    %c0_i32 = arith.constant 0 : i32
    %c0_i32_0 = arith.constant 0 : i32
    return %c0_i32 : i32
  }
  func.func @transform_1(%arg0: i32) -> (i32, i32, i32) {
    %c0_i32 = arith.constant 0 : i32
    %c0_i32_0 = arith.constant 0 : i32
    %c0_i32_1 = arith.constant 0 : i32
    return %arg0, %c0_i32, %c0_i32_0 : i32, i32, i32
  }
  func.func @transform_2(%arg0: i32) -> (i32, i32, i32) {
    %c0_i32 = arith.constant 0 : i32
    %c0_i32_0 = arith.constant 0 : i32
    %c0_i32_1 = arith.constant 0 : i32
    return %arg0, %c0_i32, %c0_i32_0 : i32, i32, i32
  }
  func.func @transform_3(%arg0: i32) -> (i32, i32, i32) {
    %c0_i32 = arith.constant 0 : i32
    %c0_i32_0 = arith.constant 0 : i32
    %c0_i32_1 = arith.constant 0 : i32
    return %arg0, %c0_i32, %c0_i32_0 : i32, i32, i32
  }
  func.func @transform_4(%arg0: i32) -> (i32, i32) {
    %c0_i32 = arith.constant 0 : i32
    %c0_i32_0 = arith.constant 0 : i32
    %c0_i32_1 = arith.constant 0 : i32
    return %c0_i32, %c0_i32_0 : i32, i32
  }
  func.func @transform_5(%arg0: i32) -> (i32, i32) {
    %c0_i32 = arith.constant 0 : i32
    %c0_i32_0 = arith.constant 0 : i32
    %c0_i32_1 = arith.constant 0 : i32
    return %c0_i32, %c0_i32_0 : i32, i32
  }
  func.func @transform_6(%arg0: i32) -> (i32, i32) {
    %c0_i32 = arith.constant 0 : i32
    %c0_i32_0 = arith.constant 0 : i32
    %c0_i32_1 = arith.constant 0 : i32
    return %c0_i32, %c0_i32_0 : i32, i32
  }
  func.func @transform_7(%arg0: i32) -> (i32, i32) {
    %c0_i32 = arith.constant 0 : i32
    %c0_i32_0 = arith.constant 0 : i32
    %c0_i32_1 = arith.constant 0 : i32
    return %c0_i32, %c0_i32_0 : i32, i32
  }
  func.func @transform_8(%arg0: i32) -> (i32, i32) {
    %c0_i32 = arith.constant 0 : i32
    %c0_i32_0 = arith.constant 0 : i32
    %c0_i32_1 = arith.constant 0 : i32
    return %c0_i32, %c0_i32_0 : i32, i32
  }
  func.func @transform_9(%arg0: i32) -> (i32, i32) {
    %c0_i32 = arith.constant 0 : i32
    %c0_i32_0 = arith.constant 0 : i32
    %c0_i32_1 = arith.constant 0 : i32
    return %c0_i32, %c0_i32_0 : i32, i32
  }
  func.func @transform_10(%arg0: i32) -> (i32, i32) {
    %c0_i32 = arith.constant 0 : i32
    %c0_i32_0 = arith.constant 0 : i32
    %c0_i32_1 = arith.constant 0 : i32
    return %c0_i32, %c0_i32_0 : i32, i32
  }
  func.func @transform_11(%arg0: i32) -> (i32, i32) {
    %c0_i32 = arith.constant 0 : i32
    %c0_i32_0 = arith.constant 0 : i32
    %c0_i32_1 = arith.constant 0 : i32
    return %c0_i32, %c0_i32_0 : i32, i32
  }
  func.func @transform_12(%arg0: i32) -> (i32, i32) {
    %c0_i32 = arith.constant 0 : i32
    %c0_i32_0 = arith.constant 0 : i32
    %c0_i32_1 = arith.constant 0 : i32
    return %c0_i32, %c0_i32_0 : i32, i32
  }
  func.func @transform_13(%arg0: i32) -> (i32, i32) {
    %c0_i32 = arith.constant 0 : i32
    %c0_i32_0 = arith.constant 0 : i32
    %c0_i32_1 = arith.constant 0 : i32
    return %c0_i32, %c0_i32_0 : i32, i32
  }
  func.func @transform_14(%arg0: i32) -> (i32, i32, i32) {
    %c0_i32 = arith.constant 0 : i32
    %c0_i32_0 = arith.constant 0 : i32
    %c0_i32_1 = arith.constant 0 : i32
    return %arg0, %c0_i32, %c0_i32_0 : i32, i32, i32
  }
}

</mosaic_0001>

<bundles_post_ra>
// kernel: rva_forward.1
= control target key start
LH: loop header
LB: loop body
LE: loop exit
PB: predicated region body
PF: predicated region fallthrough
CT: control target
= control target key end

     0   :  { %19 = vsyncpa [#allocation4], 0  ;;  %s2446_s29 = smov 0   ;;  %s2764_s0 = inlined_call_operand.vmem [shape: f32[4], index: 0, kind: input, shape index: {}]   ;;  %s2765_s1 = inlined_call_operand.vmem [shape: f32[2,16,48], index: 1, kind: input, shape index: {}]   ;;  %s2766_s2 = inlined_call_operand.vmem [shape: f32[2,16,32], index: 2, kind: input, shape index: {}]   ;;  %s2767_s3 = inlined_call_operand.vmem [shape: f32[2,8,128], index: 3, kind: input, shape index: {}]   ;;  %s2768_s4 = inlined_call_operand.vmem [shape: f32[48,64], index: 4, kind: input, shape index: {}]   ;;  %s2769_s5 = inlined_call_operand.vmem [shape: f32[1,64], index: 5, kind: input, shape index: {}]   ;;  %s2770_s6 = inlined_call_operand.vmem [shape: f32[32,128], index: 6, kind: input, shape index: {}]   ;;  %s2771_s7 = inlined_call_operand.vmem [shape: f32[1,128], index: 7, kind: input, shape index: {}]   ;;  %s2772_s8 = inlined_call_operand.vmem [shape: f32[128,128], index: 8, kind: input, shape index: {}]   ;;  %s2773_s9 = inlined_call_operand.vmem [shape: f32[1,128], index: 9, kind: input, shape index: {}]   ;;  %s2774_s10 = inlined_call_operand.vmem [shape: f32[1,32], index: 10, kind: input, shape index: {}]   ;;  %s2775_s11 = inlined_call_operand.vmem [shape: f32[1,32], index: 11, kind: input, shape index: {}]   ;;  %s2776_s12 = inlined_call_operand.vmem [shape: f32[1,32], index: 12, kind: input, shape index: {}]   ;;  %s2777_s13 = inlined_call_operand.vmem [shape: f32[1,32], index: 13, kind: input, shape index: {}]   ;;  %s2778_s14 = inlined_call_operand.vmem [shape: f32[2,8,42], index: 14, kind: output, shape index: {}]  }
   0x1 LB: > { %s2452_s30 = sadd.s32 4294967295, %s2362_s29   ;;  %p2031_p0 = scmp.ge.s32.totalorder %s2362_s29, 1  ;;  %s2362_s29 = sphi %s2446_s29, %s25_s29  }
   0x2   : > { %p365_p1 = scmp.lt.s32.totalorder %s2362_s29, 3  ;;  %s378_s17 = sshll.u32 %s2764_s0, 4  ;;  %s379_s17 = int_to_ptr.vmem [resolvable:$true] %s378_s17 }
   0x3   : > { %p2270_p3 = scmp.eq.s32.totalorder %s2452_s30, 0  ;;  %s2337_s19 = scalar_lea.vmem %s379_s17, 16 }
   0x4   : > { %p2459_p2 = pnand %p2031_p0, %p365_p1  ;;  %p2338_p6 = scmp.ne.s32.totalorder %s379_s17, %s2337_s19 }
   0x5   : > { %p2345_p10 = scmp.lt.s32.totalorder %s379_s17, %s379_s17  ;;  %p2346_p11 = scmp.lt.s32.totalorder %s2337_s19, %s2337_s19 }
   0x6   : > { %p2266_p4 = pneg %p2459_p2 }
   0x7   : > { %p2347_p12 = por %p2346_p11, %p2345_p10 }
   0x8   : > { %p2267_p5 = pnand %p2270_p3, %p2266_p4 }
   0xa   : > { %p2339_p7 = pneg %p2267_p5 }
   0xc   : > { %p2340_p8 = pnand %p2339_p7, %p2338_p6 }
   0xe   : > { %p2341_p9 = pneg %p2340_p8 }
  0x10   : > { %p2348_p13 = pnand %p2347_p12, %p2341_p9 }
  0x12   : > { %2351 = shalt.err (!%p2348_p13)
}
  0x13   : > { %s2364_s20 = smov [#allocation3]   ;;  %444 = sbr.rel (%p2459_p2) target bundleno = 2814 (0xafe), region = 76 }
  0x14   : > { %2269 = dma.vmem_to_smem (!%p2267_p5), %s379_s17, 16, %s2364_s20, [#allocation4]  }
  0x18   : > { %2357 = dma.done.wait (%p2270_p3), [#allocation4], 16  }
  0x19   : > { %2359 = vsyncadd (%p2270_p3), [#allocation4], 4294967280 }
  0x1a   : > { %450 = sfence }
  0x1b   : > { %v647_v0 = vld [vmem:[%s2770_s6 + $0x18] sm:$0xff]  ;;  %v646_v1 = vld [vmem:[%s2770_s6 + $0x10] sm:$0xff]  ;;  %p499_p0 = scmp.lt.s32.totalorder %s2452_s30, 1  ;;  %v528_v2 = vld [vmem:[%s2768_s4 + $0x28] sm:$0xff]  ;;  %vm655_vm0 = vcmask 261120   ;;  %v2365_v11 = vmov 0.0  }
  0x1c   : > { %2157 = vmatprep.subr.mxu1 %v647_v0  ;;  %v527_v3 = vld [vmem:[%s2768_s4 + $0x20] sm:$0xff]  ;;  %v645_v4 = vld [vmem:[%s2770_s6 + $0x8] sm:$0xff]  ;;  %2142 = vmatprep.subr.mxu0 %v528_v2  ;;  %v526_v5 = vld [vmem:[%s2768_s4 + $0x18] sm:$0xff]  ;;  %vm536_vm1 = vcmask 392192   ;;  %vm2366_vm2 = vmmov 0   ;;  %s2367_s16 = smov 32  }
  0x1d   : > { %2158 = vmatpush3.msra.mxu1 %v647_v0  ;;  %s2781_s30 = smov (!%p499_p0, %s2452_s30), 1  ;;  %2143 = vmatpush3.msra.mxu0 %v528_v2  ;;  %v644_v6 = vld [vmem:[%s2770_s6] sm:$0xff]  ;;  %v777_v9 = vld [vmem:[%s2772_s8 + $0x78] sm:$0xff]  ;;  %v525_v10 = vld [vmem:[%s2768_s4 + $0x10] sm:$0xff]  ;;  %s2368_s25 = smov 64   ;;  %vm1073_vm3 = vcmask 130048  }
  0x1e   : > { %2159 = vmatprep.subr.mxu1 %v646_v1  ;;  %s2083_s21 = sshll.u32 %s2781_s30, 4  ;;  %2144 = vmatprep.subr.mxu0 %v527_v3  ;;  %v776_v12 = vld [vmem:[%s2772_s8 + $0x70] sm:$0xff]  ;;  %v524_v13 = vld [vmem:[%s2768_s4 + $0x8] sm:$0xff]  ;;  %v523_v15 = vld [vmem:[%s2768_s4] sm:$0xff]  ;;  %s2040_s18 = sshll.u32 %s2781_s30, 3  ;;  %1286 = vst.msk [vmem:[#allocation2] sm:$0xff] %vm1073_vm3, %v2365_v11 }
  0x1f   : > { %2160 = vmatpush3.msra.mxu1 %v646_v1  ;;  %s508_s24 = scalar_lea.vmem %s2766_s2, %s2083_s21  ;;  %2145 = vmatpush3.msra.mxu0 %v527_v3  ;;  %s503_s22 = scalar_lea.vmem %s2765_s1, %s2083_s21  ;;  %v775_v14 = vld [vmem:[%s2772_s8 + $0x68] sm:$0xff]  ;;  %v774_v16 = vld [vmem:[%s2772_s8 + $0x60] sm:$0xff]  ;;  %v773_v19 = vld [vmem:[%s2772_s8 + $0x58] sm:$0xff]  ;;  %vm1246_vm5 = vcmask 64512   ;;  %vm1287_vm8 = vcmask 122880   ;;  %vm1274_vm13 = vcmask 261248  }
  0x20   : > { %2161 = vmatprep.subr.mxu1 %v645_v4  ;;  %v642_v7 = vld [vmem:[%s508_s24] sm:$0xff]  ;;  %v643_v8 = vld [vmem:[%s508_s24 + $0x8] sm:$0xff]  ;;  %2146 = vmatprep.subr.mxu0 %v526_v5  ;;  %v772_v20 = vld [vmem:[%s2772_s8 + $0x50] sm:$0xff]  ;;  %s512_s26 = scalar_lea.vmem %s2767_s3, %s2040_s18  ;;  %s2042_s17 = sld [smem:[#allocation3 + $0x1]]  ;;  %vm1280_vm14 = vcmask 326912   ;;  %vm1282_vm15 = vcmask 335168  }
  0x21   : > { %2162 = vmatpush3.msra.mxu1 %v645_v4  ;;  %2165 = vmatprep.mubr.msk.f32.mxu1 %vm655_vm0, %v642_v7  ;;  %v521_v17 = vld [vmem:[%s503_s22] sm:$0xff]  ;;  %v522_v18 = vld [vmem:[%s503_s22 + $0x8] sm:$0xff]  ;;  %v769_v23 = vld [vmem:[%s2772_s8 + $0x38] sm:$0xff]  ;;  %s2043_s19 = sld [smem:[#allocation3 + $0x2]]  ;;  %s2708_s27 = scalar_lea.vmem %s2778_s14, %s2040_s18 }
  0x22   : > { %2163 = vmatprep.subr.mxu1 %v644_v6  ;;  %2147 = vmatpush3.msra.mxu0 %v526_v5  ;;  %v771_v21 = vld [vmem:[%s2772_s8 + $0x48] sm:$0xff]  ;;  %v770_v22 = vld [vmem:[%s2772_s8 + $0x40] sm:$0xff]  ;;  %v768_v24 = vld [vmem:[%s2772_s8 + $0x30] sm:$0xff]  ;;  %s517_s20 = sld [smem:[#allocation3]] }
  0x23   : > { %2164 = vmatpush3.msra.mxu1 %v644_v6  ;;  %2148 = vmatprep.subr.mxu0 %v525_v10  ;;  %v767_v25 = vld [vmem:[%s2772_s8 + $0x28] sm:$0xff]  ;;  %v766_v26 = vld [vmem:[%s2772_s8 + $0x20] sm:$0xff]  ;;  %v765_v27 = vld [vmem:[%s2772_s8 + $0x18] sm:$0xff]  ;;  %s2044_s24 = sld [smem:[#allocation3 + $0x3]] }
  0x24   : > { %2166 = vmatmul.mubr.msk.f32.vlgmr.msra.gmra.mxu1 %vm655_vm0, %v643_v8  ;;  %2168 = vmatprep.subr.mxu1 %v2365_v11  ;;  %v764_v28 = vld [vmem:[%s2772_s8 + $0x10] sm:$0xff]  ;;  %v763_v29 = vld [vmem:[%s2772_s8 + $0x8] sm:$0xff]  ;;  %v762_v30 = vld [vmem:[%s2772_s8] sm:$0xff] }
  0x25   : > { %2169 = vmatpush3.msra.mxu1 %v777_v9  ;;  %2149 = vmatpush3.msra.mxu0 %v525_v10  ;;  %v761_v31 = vld [vmem:[%s512_s26] sm:$0xff]  ;;  %s2369_s26 = smov 96  }
  0x26   : > { %2170 = vmatprep.subr.mxu1 %v2365_v11  ;;  %2150 = vmatprep.subr.mxu0 %v524_v13  ;;  %v2057_v32 = vld [vmem:[%s2774_s10] ss:$0 sm:$0xff] }
  0x27   : > { %2171 = vmatpush3.msra.mxu1 %v776_v12  ;;  %2151 = vmatpush3.msra.mxu0 %v524_v13  ;;  %v2050_v33 = vld [vmem:[%s2771_s7] ss:$0 sm:$0xff] }
  0x28   : > { %2172 = vmatprep.subr.mxu1 %v2365_v11  ;;  %2152 = vmatprep.subr.mxu0 %v523_v15  ;;  %v2045_v40 = vld [vmem:[%s2769_s5] ss:$0 sm:$0xff] }
  0x29   : > { %2173 = vmatpush3.msra.mxu1 %v775_v14  ;;  %2153 = vmatpush3.msra.mxu0 %v523_v15  ;;  %v2055_v52 = vld [vmem:[%s2773_s9] ss:$0 sm:$0xff] }
  0x2a   : > { %2174 = vmatprep.subr.mxu1 %v2365_v11  ;;  %2154 = vmatprep.mubr.msk.f32.mxu0 %vm536_vm1, %v521_v17 }
  0x2b   : > { %2175 = vmatpush3.msra.mxu1 %v774_v16  ;;  %2155 = vmatmul.mubr.msk.f32.vlgmr.msra.gmra.mxu0 %vm536_vm1, %v522_v18  ;;  %vm1446_vm1 = vcmask 123905  }
  0x2c   : > { %2176 = vmatprep.subr.mxu1 %v2365_v11  ;;  %2200 = vmatprep.mubr.msk.f32.mxu1 %vm2366_vm2, %v2365_v11 }
  0x2d   : > { %2177 = vmatpush3.msra.mxu1 %v773_v19  ;;  %873 = vrot.lane.b32.xlu1 %v2057_v32, %s2367_s16 }
  0x2e   : > { %2178 = vmatprep.subr.mxu1 %v2365_v11 }
  0x2f   : > { %2179 = vmatpush3.msra.mxu1 %v772_v20 }
  0x30   : > { %2180 = vmatprep.subr.mxu1 %v2365_v11 }
  0x31   : > { %2181 = vmatpush3.msra.mxu1 %v771_v21 }
  0x32   : > { %2182 = vmatprep.subr.mxu1 %v2365_v11 }
  0x33   : > { %2183 = vmatpush3.msra.mxu1 %v770_v22 }
  0x34   : > { %2184 = vmatprep.subr.mxu1 %v2365_v11 }
  0x35   : > { %2185 = vmatpush3.msra.mxu1 %v769_v23 }
  0x36   : > { %2186 = vmatprep.subr.mxu1 %v2365_v11 }
  0x37   : > { %2187 = vmatpush3.msra.mxu1 %v768_v24 }
  0x38   : > { %2188 = vmatprep.subr.mxu1 %v2365_v11 }
  0x39   : > { %2189 = vmatpush3.msra.mxu1 %v767_v25  ;;  %v2069_v25 = vld [vmem:[%s2777_s13] ss:$0 sm:$0xff] }
  0x3a   : > { %2190 = vmatprep.subr.mxu1 %v2365_v11 }
  0x3b   : > { %2191 = vmatpush3.msra.mxu1 %v766_v26 }
  0x3c   : > { %2192 = vmatprep.subr.mxu1 %v2365_v11 }
  0x3d   : > { %2193 = vmatpush3.msra.mxu1 %v765_v27 }
  0x3e   : > { %2194 = vmatprep.subr.mxu1 %v2365_v11 }
  0x3f   : > { %2195 = vmatpush3.msra.mxu1 %v764_v28 }
  0x40   : > { %2196 = vmatprep.subr.mxu1 %v2365_v11 }
  0x41   : > { %2197 = vmatpush3.msra.mxu1 %v763_v29 }
  0x42   : > { %2198 = vmatprep.subr.mxu1 %v2365_v11 }
  0x43   : > { %2199 = vmatpush3.msra.mxu1 %v762_v30 }
  0x44   : > { %2201 = vmatmul.mubr.f32.vlgmr.msra.gmra.mxu1 %v761_v31  ;;  %2237 = vmatprep.subr.mxu1 %v2365_v11 }
  0x45   : > { %2239 = vmatprep.mubr.msk.f32.mxu1 %vm2366_vm2, %v2365_v11 }
  0x9f   : > { %v874_v5 = vpop.permute.xlu1 %873 }
  0xe4   : > { %v2167_v34 = vpop.f32.mrf.mxu1 }
  0xe5   : > { %v734_v35 = vadd.f32 %v2167_v34, %v2050_v33  ;;  %v1147_v34 = vld [vmem:[%s2776_s12] sm:$0x1] }
  0xe6   : > { %v728_v36 = vpop.f32.mrf.mxu1 }
  0xe7   : > { %v2054_v37 = vmul.f32 -1.442695, %v734_v35  ;;  %v729_v38 = vadd.f32 %v2050_v33, %v728_v36 }
  0xe9   : > { %v2053_v39 = vmul.f32 -1.442695, %v729_v38  ;;  %2287 = vpow2.f32 %v2054_v37 }
  0xeb   : > { %2289 = vpow2.f32 %v2053_v39  ;;  %v2156_v41 = vpop.f32.mrf.mxu0 }
  0xec   : > { %v615_v42 = vadd.f32 %v2156_v41, %v2045_v40 }
  0xed   : > { %v609_v48 = vpop.f32.mrf.mxu0 }
  0xee   : > { %v2049_v43 = vmul.f32 -1.442695, %v615_v42  ;;  %v610_v51 = vadd.f32 %v2045_v40, %v609_v48  ;;  %v1240_v48 = vstv %s2042_s17 }
  0xf0   : > { %2291 = vpow2.f32 %v2049_v43  ;;  %v2048_v53 = vmul.f32 -1.442695, %v610_v51 }
  0xf6   : > { %v2288_v44 = vpop.eup %2287 }
  0xf7   : > { %v746_v47 = vadd.f32 1.0, %v2288_v44 }
  0xf8   : > { %v2290_v45 = vpop.eup %2289 }
  0xf9   : > { %v745_v46 = vadd.f32 1.0, %v2290_v45 }
  0xfb   : > { %2293 = vrcp.f32 %v745_v46 }
  0xfc   : > { %2295 = vrcp.f32 %v746_v47 }
  0xfd   : > { %v2292_v49 = vpop.eup %2291 }
  0xfe   : > { %v627_v50 = vadd.f32 1.0, %v2292_v49 }
 0x100   : > { %2297 = vrcp.f32 %v627_v50 }
 0x101   : > { %2299 = vpow2.f32 %v2048_v53 }
 0x104   : > { %v851_v54 = vpop.f32.mrf.mxu1 }
 0x105   : > { %v852_v55 = vadd.f32 %v2055_v52, %v851_v54 }
 0x106   : > { %v2202_v56 = vpop.f32.mrf.mxu1 }
 0x107   : > { %v2056_v57 = vmul.f32 -1.442695, %v852_v55 }
 0x108   : > { %v2294_v58 = vpop.eup %2293 }
 0x109   : > { %2301 = vpow2.f32 %v2056_v57  ;;  %753 = vrot.lane.b32.xlu0 %v2294_v58, %s2368_s25  ;;  %v2296_v59 = vpop.eup %2295  ;;  %v1070_v58 = vstv %s517_s20 }
 0x10d   : > { %755 = vrot.lane.b32.xlu0 %v2296_v59, %s2368_s25  ;;  %v2298_v60 = vpop.eup %2297 }
 0x10e   : > { %v2300_v61 = vpop.eup %2299 }
 0x10f   : > { %v626_v0 = vadd.f32 1.0, %v2300_v61 }
 0x111   : > { %636 = vrot.lane.b32.xlu0 %v2298_v60, %s2369_s26 }
 0x116   : > { %v2302_v62 = vpop.eup %2301 }
 0x117   : > { %v859_v63 = vadd.f32 1.0, %v2302_v62 }
 0x119   : > { %2303 = vrcp.f32 %v859_v63 }
 0x11a   : > { %2305 = vrcp.f32 %v626_v0 }
 0x11b   : > { %2307 = vtanh.f32 %v729_v38 }
 0x11c   : > { %2309 = vtanh.f32 %v734_v35  ;;  %v1226_v35 = vlaneseq }
 0x11d   : > { %2311 = vtanh.f32 %v615_v42 }
 0x11e   : > { %2313 = vtanh.f32 %v852_v55  ;;  %v1227_v37 = vshrl.u32 %v1226_v35, 7  ;;  %v2652_v38 = vand.u32 127, %v1226_v35  ;;  %v2066_v35 = vld [vmem:[%s2775_s11] ss:$0 sm:$0xff] }
 0x11f   : > { %2315 = vtanh.f32 %v610_v51  ;;  %v1242_v51 = vstv %s2043_s19 }
 0x120   : > { %v1231_v41 = vsub.s32 %v1227_v37, %v2652_v38  ;;  %vm1230_vm4 = vcmp.le.s32.totalorder %v2652_v38, %v1227_v37  ;;  %v1237_v49 = vsub.s32 0, %v1227_v37 }
 0x122   : > { %v1232_v45 = vadd.s32 1, %v1231_v41 }
 0x124   : > { %v1233_v46 = vcvt.s32.f32 %v1232_v45 }
 0x126   : > { %v2304_v1 = vpop.eup %2303  ;;  %v1234_v47 = vsel %vm1230_vm4, %v1233_v46, 0.0 }
 0x127   : > { %863 = vrot.lane.b32.xlu1 %v2304_v1, %s2369_s26  ;;  %v2306_v2 = vpop.eup %2305  ;;  %v1241_v50 = vmul.f32 %v1240_v48, %v1234_v47 }
 0x128   : > { %v2308_v3 = vpop.eup %2307 }
 0x129   : > { %v2310_v8 = vpop.eup %2309  ;;  %v1243_v57 = vadd.f32 %v1242_v51, %v1241_v50 }
 0x12a   : > { %v2312_v14 = vpop.eup %2311 }
 0x12b   : > { %634 = vrot.lane.b32.xlu1 %v2306_v2, %s2369_s26  ;;  %v2314_v18 = vpop.eup %2313 }
 0x12c   : > { %v2316_v21 = vpop.eup %2315 }
 0x17b   : > { %v754_v4 = vpop.permute.xlu0 %753 }
 0x17c   : > { %v2610_v6 = vmul.f32 %v2308_v3, %v754_v4 }
 0x17e   : > { %v876_v7 = vmul.f32 %v874_v5, %v2610_v6  ;;  %v2616_v13 = vmul.f32 %v2610_v6, %v2610_v6 }
 0x17f   : > { %v756_v9 = vpop.permute.xlu0 %755 }
 0x180   : > { %v760_v10 = vmul.f32 %v2310_v8, %v756_v9  ;;  %880 = vrot.lane.b32.xlu0 %v876_v7, %s2369_s26 }
 0x182   : > { %v877_v12 = vmul.f32 %v874_v5, %v760_v10  ;;  %v970_v17 = vmul.f32 %v760_v10, %v760_v10 }
 0x183   : > { %v637_v15 = vpop.permute.xlu0 %636 }
 0x184   : > { %v641_v16 = vmul.f32 %v2312_v14, %v637_v15  ;;  %975 = vrot.lane.b32.xlu0 %v2616_v13, %s2369_s26  ;;  %882 = vrot.lane.b32.xlu1 %v877_v12, %s2369_s26 }
 0x186   : > { %2203 = vmatprep.subr.msk.mxu0 %vm655_vm0, %v641_v16  ;;  %v972_v24 = vmul.f32 %v641_v16, %v641_v16 }
 0x187   : > { %2204 = vmatpush3.xpose.msk.msra.mxu0 %vm655_vm0, %v641_v16 }
 0x188   : > { %977 = vrot.lane.b32.xlu1 %v970_v17, %s2369_s26 }
 0x199   : > { %v864_v19 = vpop.permute.xlu1 %863 }
 0x19a   : > { %v866_v20 = vmul.f32 %v2314_v18, %v864_v19  ;;  %v1096_v18 = vsel %vm655_vm0, %v2616_v13, 0.0 }
 0x19c   : > { %1149 = vrot.lane.b32.xlu0 %v866_v20, %s2368_s25  ;;  %v1143_v26 = vmul.f32 %v2069_v25, %v866_v20  ;;  %s2370_s25 = smov 16  }
 0x19d   : > { %v635_v22 = vpop.permute.xlu1 %634 }
 0x19e   : > { %v640_v23 = vmul.f32 %v2316_v21, %v635_v22  ;;  %v1144_v27 = vsel %vm655_vm0, %v1143_v26, 0.0 }
 0x1a0   : > { %2205 = vmatprep.subr.msk.mxu0 %vm655_vm0, %v640_v23  ;;  %v971_v31 = vmul.f32 %v640_v23, %v640_v23 }
 0x1a1   : > { %2206 = vmatpush3.xpose.msk.msra.mxu0 %vm655_vm0, %v640_v23 }
 0x1a2   : > { %2210 = vmatprep.subr.msk.mxu0 %vm655_vm0, %v972_v24 }
 0x1ac   : > { %1145 = vadd.xlane.f32.xlu1 %v1144_v27 }
 0x1f2   : > { %v881_v28 = vpop.permute.xlu0 %880 }
 0x1f3   : > { %2207 = vmatprep.mubr.msk.f32.mxu0 %vm655_vm0, %v881_v28 }
 0x1f6   : > { %v976_v29 = vpop.permute.xlu0 %975  ;;  %v883_v30 = vpop.permute.xlu1 %882 }
 0x1f7   : > { %2208 = vmatmul.mubr.msk.f32.vlgmr.msra.gmra.mxu0 %vm655_vm0, %v883_v30 }
 0x1f8   : > { %2211 = vmatpush3.xpose.msk.msra.mxu0 %vm655_vm0, %v972_v24  ;;  %2214 = vmatprep.mubr.msk.f32.mxu0 %vm655_vm0, %v976_v29 }
 0x1f9   : > { %2212 = vmatprep.subr.msk.mxu0 %vm655_vm0, %v971_v31 }
 0x1fa   : > { %v978_v32 = vpop.permute.xlu1 %977 }
 0x1fc   : > { %2213 = vmatpush3.xpose.msk.msra.mxu0 %vm655_vm0, %v971_v31 }
 0x1fd   : > { %2217 = vmatprep.subr.mxu0 %v2365_v11 }
 0x1ff   : > { %2215 = vmatmul.mubr.msk.f32.vlgmr.msra.gmra.mxu0 %vm655_vm0, %v978_v32 }
 0x200   : > { %2219 = vmatprep.mubr.msk.f32.mxu0 %vm2366_vm2, %v2365_v11 }
 0x20e   : > { %v1150_v33 = vpop.permute.xlu0 %1149 }
 0x20f   : > { %2218 = vmatpush3.xpose.msk.msra.mxu0 %vm655_vm0, %v1150_v33 }
 0x210   : > { %2222 = vmatprep.subr.mxu0 %v2365_v11 }
 0x212   : > { %2220 = vmatmul.mubr.msk.f32.vlgmr.msra.gmra.mxu0 %vm655_vm0, %v1147_v34 }
 0x213   : > { %2224 = vmatprep.mubr.msk.f32.mxu0 %vm2366_vm2, %v2365_v11 }
 0x235   : > { %v1146_v59 = vpop.xlane.xlu1 %1145 }
 0x2b7   : > { %v2209_v36 = vpop.f32.mrf.mxu0 }
 0x2b9   : > { %v960_v39 = vpop.f32.mrf.mxu0 }
 0x2bf   : > { %v2216_v40 = vpop.f32.mrf.mxu0 }
 0x2c0   : > { %v1065_v43 = vmax.f32 %v2216_v40, 1e-24 }
 0x2c1   : > { %v1055_v42 = vpop.f32.mrf.mxu0 }
 0x2c2   : > { %v1064_v44 = vmax.f32 %v1055_v42, 1e-24 }
 0x2c4   : > { %2317 = vrsqrt.f32 %v1064_v44 }
 0x2c5   : > { %2319 = vrsqrt.f32 %v1065_v43 }
 0x2d1   : > { %v2318_v52 = vpop.eup %2317 }
 0x2d2   : > { %v1222_v53 = vpop.f32.mrf.mxu0  ;;  %v1068_v54 = vmul.f32 %v2318_v52, %v960_v39  ;;  %v2320_v55 = vpop.eup %2319 }
 0x2d3   : > { %v1238_v56 = vrot.slane %v1222_v53, %v1237_v49  ;;  %v1069_v63 = vmul.f32 %v2320_v55, %v2209_v36 }
 0x2d4   : > { %v2221_v60 = vpop.f32.mrf.mxu0  ;;  %v2658_v61 = vadd.f32 %v1070_v58, %v1068_v54 }
 0x2d5   : > { %v1239_v62 = vadd.f32 %v1238_v56, %v1146_v59  ;;  %v1072_v3 = vadd.f32 %v1070_v58, %v1069_v63 }
 0x2d6   : > { %v1074_v23 = vsel %vm1073_vm3, %v2658_v61, -inf }
 0x2d7   : > { %v1244_v0 = vadd.f32 %v1243_v57, %v1239_v62  ;;  %v1077_v4 = vsel %vm1073_vm3, %v1072_v3, -inf }
 0x2d9   : > { %v1245_v1 = vsel %vm1230_vm4, %v1244_v0, -inf  ;;  %vm1610_vm4 = vcmask 125955  }
 0x2da   : > { %v1247_v2 = vsel %vm1246_vm5, %v1245_v1, -inf }
 0x2db   : > { %1248 = vmax.xlane.f32.xlu0 %v1247_v2 }
 0x2df   : > { %1078 = vmax.xlane.f32.xlu0 %v1077_v4 }
 0x364   : > { %v1249_v5 = vpop.xlane.xlu0 %1248 }
 0x365   : > { %vm1250_vm6 = vcmp.eq.f32.partialorder %v1245_v1, %v1249_v5 }
 0x366   : > { %v1251_v7 = vsel %vm1250_vm6, %v2652_v38, 9  ;;  %vm1692_vm6 = vcmask 126980  }
 0x367   : > { %v1252_v8 = vsel %vm1246_vm5, %v1251_v7, 2147483647 }
 0x368   : > { %v1079_v9 = vpop.xlane.xlu0 %1078  ;;  %v1254_v10 = vshra.s32 %v1252_v8, 16  ;;  %v1253_v19 = vand.u32 65535, %v1252_v8 }
 0x369   : > { %v1081_v12 = vsub.f32 %v1072_v3, %v1079_v9 }
 0x36a   : > { %v1256_v14 = vcvt.s32.f32 %v1254_v10  ;;  %v1255_v21 = vcvt.s32.f32 %v1253_v19 }
 0x36b   : > { %v1084_v15 = vmul.f32 1.442695, %v1081_v12 }
 0x36c   : > { %1257 = vmin.xlane.f32.xlu1 %v1256_v14 }
 0x36d   : > { %2321 = vpow2.f32 %v1084_v15 }
 0x37a   : > { %v2322_v16 = vpop.eup %2321 }
 0x37b   : > { %v1089_v17 = vsel %vm1073_vm3, %v2322_v16, 0.0 }
 0x37c   : > { %1090 = vadd.xlane.f32.xlu0 %v1089_v17 }
 0x380   : > { %1097 = vadd.xlane.f32.xlu0 %v1096_v18 }
 0x3f5   : > { %v1258_v20 = vpop.xlane.xlu1 %1257 }
 0x3f6   : > { %vm1259_vm7 = vcmp.eq.f32.partialorder %v1256_v14, %v1258_v20  ;;  %v1264_v40 = vcvt.f32.s32 %v1258_v20 }
 0x3f7   : > { %v1260_v22 = vsel %vm1259_vm7, %v1255_v21, inf  ;;  %vm1774_vm7 = vcmask 128005  }
 0x3f8   : > { %1261 = vmin.xlane.f32.xlu1 %v1260_v22  ;;  %v1265_v42 = vshll.u32 %v1264_v40, 16 }
 0x3fc   : > { %1075 = vmax.xlane.f32.xlu1 %v1074_v23 }
 0x405   : > { %v1091_v24 = vpop.xlane.xlu0 %1090 }
 0x406   : > { %2323 = vrcp.f32 %v1091_v24 }
 0x409   : > { %v1098_v25 = vpop.xlane.xlu0 %1097 }
 0x40a   : > { %2325 = vrsqrt.f32 %v1098_v25  ;;  %vm1101_vm9 = vcmp.eq.f32.partialorder %v1098_v25, inf  ;;  %v1104_v29 = vand.u32 2147483648, %v1098_v25  ;;  %vm1103_vm10 = vcmp.eq.f32.partialorder %v1098_v25, 0.0 }
 0x413   : > { %v2324_v26 = vpop.eup %2323 }
 0x414   : > { %v1095_v27 = vmul.f32 %v2324_v26, %v2322_v16 }
 0x416   : > { %1288 = vst.msk [vmem:[#allocation2] sm:$0x1] %vm1287_vm8, %v1095_v27 }
 0x417   : > { %v2326_v13 = vpop.eup %2325 }
 0x418   : > { %v1100_v28 = vmul.f32 %v2326_v13, %v1098_v25 }
 0x41a   : > { %v1102_v30 = vsel %vm1101_vm9, %v1098_v25, %v1100_v28 }
 0x41b   : > { %v1105_v31 = vsel %vm1103_vm10, %v1104_v29, %v1102_v30 }
 0x41c   : > { %v1106_v32 = vmax.f32 %v1105_v31, 1e-12 }
 0x41d   : > { %v1289_v33 = vld [vmem:[#allocation2] sm:$0xff] }
 0x41e   : > { %2327 = vrcp.f32 %v1106_v32  ;;  %2223 = vmatpush3.msra.mxu0 %v1289_v33 }
 0x41f   : > { %2227 = vmatprep.subr.mxu0 %v2365_v11 }
 0x42b   : > { %v2328_v34 = vpop.eup %2327 }
 0x42c   : > { %v1108_v36 = vmul.f32 %v2328_v34, %v2610_v6 }
 0x42e   : > { %v1116_v37 = vmul.f32 %v2066_v35, %v1108_v36 }
 0x430   : > { %v1117_v39 = vsel %vm655_vm0, %v1116_v37, 0.0  ;;  %vm1284_vm0 = vcmask 343368  }
 0x431   : > { %1118 = vadd.xlane.f32.xlu0 %v1117_v39 }
 0x481   : > { %v1262_v41 = vpop.xlane.xlu1 %1261 }
 0x482   : > { %v1263_v43 = vcvt.f32.s32 %v1262_v41 }
 0x484   : > { %v1266_v44 = vadd.s32 %v1265_v42, %v1263_v43 }
 0x485   : > { %v1076_v45 = vpop.xlane.xlu1 %1075 }
 0x486   : > { %vm1267_vm11 = vcmp.eq.s32.totalorder %v2652_v38, %v1266_v44  ;;  %v1080_v46 = vsub.f32 %v2658_v61, %v1076_v45  ;;  %v1120_v38 = vstv %s2044_s24 }
 0x487   : > { %v2681_v47 = vsel %vm1267_vm11, 1.0, %v2365_v11 }
 0x488   : > { %v1082_v48 = vmul.f32 1.442695, %v1080_v46  ;;  %2225 = vmatmul.mubr.msk.f32.vlgmr.msra.gmra.mxu0 %vm1246_vm5, %v2681_v47  ;;  %v1368_v8 = vrot.slane %v2681_v47, 1  ;;  %v1450_v19 = vrot.slane %v2681_v47, 2  ;;  %v1532_v26 = vrot.slane %v2681_v47, 3 }
 0x489   : > { %2229 = vmatprep.mubr.msk.f32.mxu0 %vm2366_vm2, %v2365_v11  ;;  %v1614_v32 = vrot.slane %v2681_v47, 4  ;;  %v1696_v40 = vrot.slane %v2681_v47, 5 }
 0x48a   : > { %2329 = vpow2.f32 %v1082_v48  ;;  %v1778_v48 = vrot.slane %v2681_v47, 6 }
 0x497   : > { %v2330_v6 = vpop.eup %2329 }
 0x498   : > { %v1086_v49 = vsel %vm1073_vm3, %v2330_v6, 0.0  ;;  %vm1528_vm3 = vcmask 124930  }
 0x499   : > { %1087 = vadd.xlane.f32.xlu1 %v1086_v49 }
 0x4aa   : > { %1277 = vrot.lane.b32.xlu1 %v2681_v47, %s2367_s16 }
 0x4ba   : > { %v1119_v50 = vpop.xlane.xlu0 %1118 }
 0x4bb   : > { %v1121_v51 = vadd.f32 %v1120_v38, %v1119_v50 }
 0x4bd   : > { %v2068_v52 = vmul.f32 -1.442695, %v1121_v51  ;;  %vm1122_vm12 = vcmp.ge.f32.partialorder %v1121_v51, 0.0 }
 0x4be   : > { %v2067_v58 = vsel %vm1122_vm12, 1.0, %v2365_v11 }
 0x4bf   : > { %2331 = vpow2.f32 %v2068_v52  ;;  %v1125_v60 = vsub.f32 1.0, %v2067_v58  ;;  %v1860_v52 = vrot.slane %v2681_v47, 7 }
 0x4cc   : > { %v2332_v54 = vpop.eup %2331 }
 0x4cd   : > { %v1129_v55 = vadd.f32 1.0, %v2332_v54 }
 0x522   : > { %v1088_v53 = vpop.xlane.xlu1 %1087 }
 0x523   : > { %2333 = vrcp.f32 %v1088_v53 }
 0x524   : > { %2335 = vrcp.f32 %v1129_v55 }
 0x526   : > { %v1278_v10 = vpop.permute.xlu1 %1277 }
 0x530   : > { %v2334_v56 = vpop.eup %2333 }
 0x531   : > { %v1093_v57 = vmul.f32 %v2334_v56, %v2330_v6  ;;  %v2336_v59 = vpop.eup %2335 }
 0x532   : > { %v1132_v61 = vmul.f32 %v2336_v59, %v1125_v60  ;;  %v1134_v62 = vsub.f32 1.0, %v2336_v59 }
 0x533   : > { %1271 = vrot.lane.b32.xlu0 %v1093_v57, %s2370_s25 }
 0x534   : > { %v1133_v63 = vadd.f32 %v2067_v58, %v1132_v61  ;;  %v2691_v0 = vmul.f32 %v1134_v62, %v1125_v60 }
 0x536   : > { %v2693_v2 = vmul.f32 %v1133_v63, %v1093_v57 }
 0x548   : > { %v1358_v1 = vpop.f32.mrf.mxu0 }
 0x549   : > { %v1363_v3 = vmul.f32 %v1358_v1, %v2691_v0 }
 0x54a   : > { %v2226_v4 = vpop.f32.mrf.mxu0 }
 0x54b   : > { %v1364_v5 = vadd.f32 %v1363_v3, %v2693_v2 }
 0x54d   : > { %1366 = vst.msk [vmem:[#allocation2 + $0x1] sm:$0x1] %vm1287_vm8, %v1364_v5 }
 0x554   : > { %v1367_v7 = vld [vmem:[#allocation2] sm:$0xff] }
 0x555   : > { %2228 = vmatpush3.msra.mxu0 %v1367_v7 }
 0x556   : > { %2230 = vmatmul.mubr.msk.f32.vlgmr.msra.gmra.mxu0 %vm1246_vm5, %v1368_v8  ;;  %2232 = vmatprep.subr.mxu0 %v2365_v11 }
 0x557   : > { %2234 = vmatprep.mubr.msk.f32.mxu0 %vm2366_vm2, %v2365_v11 }
 0x5a5   : > { %v1272_v9 = vpop.permute.xlu0 %1271 }
 0x5a6   : > { %1275 = vst.msk [vmem:[%s2708_s27] sm:$0xff] %vm1274_vm13, %v1272_v9 }
 0x5a7   : > { %1281 = vst.msk [vmem:[%s2708_s27] sm:$0xff] %vm1280_vm14, %v1278_v10 }
 0x5a8   : > { %1283 = vst.msk [vmem:[%s2708_s27] sm:$0xff] %vm1282_vm15, %v2067_v58 }
 0x5a9   : > { %1285 = vst.msk [vmem:[%s2708_s27] sm:$0xff] %vm1284_vm0, %v1125_v60 }
 0x5aa   : > { %1365 = vst.msk [vmem:[%s2708_s27] sm:$0x1] %vm1287_vm8, %v1364_v5  ;;  %vm1938_vm8 = vcmask 130055  }
 0x616   : > { %v1437_v12 = vpop.f32.mrf.mxu0 }
 0x617   : > { %v1442_v14 = vrot.slane %v1437_v12, 7 }
 0x618   : > { %v2231_v15 = vpop.f32.mrf.mxu0 }
 0x619   : > { %v1444_v16 = vmul.f32 %v1442_v14, %v2691_v0 }
 0x61b   : > { %v1445_v17 = vadd.f32 %v1444_v16, %v2693_v2 }
 0x61d   : > { %1447 = vst.msk [vmem:[%s2708_s27] sm:$0x2] %vm1446_vm1, %v1445_v17  ;;  %1448 = vst.msk [vmem:[#allocation2 + $0x1] sm:$0x2] %vm1446_vm1, %v1445_v17 }
 0x624   : > { %v1449_v18 = vld [vmem:[#allocation2] sm:$0xff] }
 0x625   : > { %2233 = vmatpush3.msra.mxu0 %v1449_v18 }
 0x626   : > { %2235 = vmatmul.mubr.msk.f32.vlgmr.msra.gmra.mxu0 %vm1246_vm5, %v1450_v19  ;;  %2242 = vmatprep.subr.mxu0 %v2365_v11 }
 0x627   : > { %2244 = vmatprep.mubr.msk.f32.mxu0 %vm2366_vm2, %v2365_v11 }
 0x6e6   : > { %v1519_v20 = vpop.f32.mrf.mxu0 }
 0x6e7   : > { %v1524_v21 = vrot.slane %v1519_v20, 6 }
 0x6e8   : > { %v2236_v22 = vpop.f32.mrf.mxu0 }
 0x6e9   : > { %v1526_v23 = vmul.f32 %v1524_v21, %v2691_v0 }
 0x6eb   : > { %v1527_v24 = vadd.f32 %v1526_v23, %v2693_v2 }
 0x6ed   : > { %1529 = vst.msk [vmem:[%s2708_s27] sm:$0x4] %vm1528_vm3, %v1527_v24  ;;  %1530 = vst.msk [vmem:[#allocation2 + $0x1] sm:$0x4] %vm1528_vm3, %v1527_v24 }
 0x6f4   : > { %v1531_v25 = vld [vmem:[#allocation2] sm:$0xff] }
 0x6f5   : > { %2238 = vmatpush3.msra.mxu1 %v1531_v25 }
 0x6f6   : > { %2240 = vmatmul.mubr.msk.f32.vlgmr.msra.gmra.mxu1 %vm1246_vm5, %v1532_v26  ;;  %2247 = vmatprep.subr.mxu1 %v2365_v11 }
 0x6f7   : > { %2249 = vmatprep.mubr.msk.f32.mxu1 %vm2366_vm2, %v2365_v11 }
 0x7b6   : > { %v1601_v27 = vpop.f32.mrf.mxu1 }
 0x7b7   : > { %v1606_v13 = vrot.slane %v1601_v27, 5 }
 0x7b8   : > { %v2241_v28 = vpop.f32.mrf.mxu1 }
 0x7b9   : > { %v1608_v29 = vmul.f32 %v1606_v13, %v2691_v0 }
 0x7bb   : > { %v1609_v30 = vadd.f32 %v1608_v29, %v2693_v2 }
 0x7bd   : > { %1611 = vst.msk [vmem:[%s2708_s27] sm:$0x8] %vm1610_vm4, %v1609_v30  ;;  %1612 = vst.msk [vmem:[#allocation2 + $0x1] sm:$0x8] %vm1610_vm4, %v1609_v30 }
 0x7c4   : > { %v1613_v31 = vld [vmem:[#allocation2] sm:$0xff] }
 0x7c5   : > { %2243 = vmatpush3.msra.mxu0 %v1613_v31 }
 0x7c6   : > { %2245 = vmatmul.mubr.msk.f32.vlgmr.msra.gmra.mxu0 %vm1246_vm5, %v1614_v32  ;;  %2252 = vmatprep.subr.mxu0 %v2365_v11 }
 0x7c7   : > { %2254 = vmatprep.mubr.msk.f32.mxu0 %vm2366_vm2, %v2365_v11 }
 0x886   : > { %v1683_v33 = vpop.f32.mrf.mxu0 }
 0x887   : > { %v1688_v34 = vrot.slane %v1683_v33, 4 }
 0x888   : > { %v2246_v35 = vpop.f32.mrf.mxu0 }
 0x889   : > { %v1690_v36 = vmul.f32 %v1688_v34, %v2691_v0 }
 0x88b   : > { %v1691_v37 = vadd.f32 %v1690_v36, %v2693_v2 }
 0x88d   : > { %1693 = vst.msk [vmem:[%s2708_s27] sm:$0x10] %vm1692_vm6, %v1691_v37  ;;  %1694 = vst.msk [vmem:[#allocation2 + $0x1] sm:$0x10] %vm1692_vm6, %v1691_v37 }
 0x894   : > { %v1695_v39 = vld [vmem:[#allocation2] sm:$0xff] }
 0x895   : > { %2248 = vmatpush3.msra.mxu1 %v1695_v39 }
 0x896   : > { %2250 = vmatmul.mubr.msk.f32.vlgmr.msra.gmra.mxu1 %vm1246_vm5, %v1696_v40  ;;  %2257 = vmatprep.subr.mxu1 %v2365_v11 }
 0x897   : > { %2259 = vmatprep.mubr.msk.f32.mxu1 %vm2366_vm2, %v2365_v11  ;;  %vm1856_vm2 = vcmask 129030  }
 0x956   : > { %v1765_v41 = vpop.f32.mrf.mxu1 }
 0x957   : > { %v1770_v42 = vrot.slane %v1765_v41, 3 }
 0x958   : > { %v2251_v43 = vpop.f32.mrf.mxu1 }
 0x959   : > { %v1772_v44 = vmul.f32 %v1770_v42, %v2691_v0 }
 0x95b   : > { %v1773_v45 = vadd.f32 %v1772_v44, %v2693_v2 }
 0x95d   : > { %1775 = vst.msk [vmem:[%s2708_s27] sm:$0x20] %vm1774_vm7, %v1773_v45  ;;  %1776 = vst.msk [vmem:[#allocation2 + $0x1] sm:$0x20] %vm1774_vm7, %v1773_v45 }
 0x964   : > { %v1777_v46 = vld [vmem:[#allocation2] sm:$0xff] }
 0x965   : > { %2253 = vmatpush3.msra.mxu0 %v1777_v46 }
 0x966   : > { %2255 = vmatmul.mubr.msk.f32.vlgmr.msra.gmra.mxu0 %vm1246_vm5, %v1778_v48 }
 0xa26   : > { %v1847_v6 = vpop.f32.mrf.mxu0 }
 0xa27   : > { %v1852_v49 = vrot.slane %v1847_v6, 2 }
 0xa28   : > { %v2256_v11 = vpop.f32.mrf.mxu0 }
 0xa29   : > { %v1854_v38 = vmul.f32 %v1852_v49, %v2691_v0 }
 0xa2b   : > { %v1855_v50 = vadd.f32 %v1854_v38, %v2693_v2 }
 0xa2d   : > { %1857 = vst.msk [vmem:[%s2708_s27] sm:$0x40] %vm1856_vm2, %v1855_v50  ;;  %1858 = vst.msk [vmem:[#allocation2 + $0x1] sm:$0x40] %vm1856_vm2, %v1855_v50 }
 0xa34   : > { %v1859_v51 = vld [vmem:[#allocation2] sm:$0xff] }
 0xa35   : > { %2258 = vmatpush3.msra.mxu1 %v1859_v51 }
 0xa36   : > { %2260 = vmatmul.mubr.msk.f32.vlgmr.msra.gmra.mxu1 %vm1246_vm5, %v1860_v52 }
 0xaf6   : > { %v1929_v53 = vpop.f32.mrf.mxu1 }
 0xaf7   : > { %v1934_v54 = vrot.slane %v1929_v53, 1 }
 0xaf8   : > { %v2261_v55 = vpop.f32.mrf.mxu1 }
 0xaf9   : > { %v1936_v56 = vmul.f32 %v1934_v54, %v2691_v0 }
 0xafb   : > { %v1937_v57 = vadd.f32 %v1936_v56, %v2693_v2 }
 0xafd   : > { %1939 = vst.msk [vmem:[%s2708_s27] sm:$0x80] %vm1938_vm8, %v1937_v57 }
 0xafe PF: > { %s25_s29 = sadd.s32 1, %s2362_s29  }
 0xaff   : > { %p22_p1 = scmp.ge.s32.totalorder %s25_s29, 4  }
 0xb01   :  { %24 = sbr.rel (!%p22_p1) target bundleno = 1 (0x1), region = 117 }
 0xb06   :  { %1959 = vsyncpa [#allocation4], 1 }
 0xb07   :  { %1961 = vsyncpa [#allocation4 + $0x1], 1 }

</bundles_post_ra>
